<compile_context>
chip_gen: v6e
topology: v6e:2x2x1
jax: 0.10.0
libtpu: 0.0.40
codegen_flags: <defaults>
</compile_context>

<pallas_src>
import functools

import jax
import jax.numpy as jnp
from jax import lax
from jax.experimental import pallas as pl
from jax.experimental.pallas import tpu as pltpu


def _triplet_loss_kernel(img_i_ref, txt_j_ref, txt_i_ref, img_j_ref,
                         out_ref, row_acc, col_acc, *, margin, max_violation):
    i = pl.program_id(0)
    j = pl.program_id(1)
    last_i = pl.num_programs(0) - 1
    last_j = pl.num_programs(1) - 1

    tm = img_i_ref.shape[0]
    tn = txt_j_ref.shape[0]

    # ---- accumulator init ---------------------------------------------------
    @pl.when(jnp.logical_and(i == 0, j == 0))
    def _():
        out_ref[...] = jnp.zeros_like(out_ref)

    @pl.when(j == 0)
    def _():
        row_acc[...] = jnp.zeros_like(row_acc)

    if max_violation:
        @pl.when(i == 0)
        def _():
            col_acc[j] = jnp.zeros((1, tn), jnp.float32)

    # ---- score tile on the MXU (contract feature dims; no transpose) --------
    img_i = img_i_ref[...]                        # (tm, D), native dtype
    txt_j = txt_j_ref[...]                        # (tn, D), native dtype
    scores = lax.dot_general(
        img_i, txt_j, (((1,), (1,)), ((), ())),
        preferred_element_type=jnp.float32)       # (tm, tn) f32

    # ---- diagonal similarities: elementwise mul + lane reduce (f32 accum) ---
    d1 = jnp.sum(img_i.astype(jnp.float32) * txt_i_ref[...].astype(jnp.float32),
                 axis=1, keepdims=True)                                   # (tm, 1)
    d2 = jnp.sum(img_j_ref[...].astype(jnp.float32) * txt_j.astype(jnp.float32),
                 axis=1, keepdims=True).T                                 # (1, tn)

    # ---- fold the diagonal masked_fill into the clamp ------------------------
    row_g = i * tm + lax.broadcasted_iota(jnp.int32, (tm, tn), 0)
    col_g = j * tn + lax.broadcasted_iota(jnp.int32, (tm, tn), 1)
    pen = jnp.where(row_g == col_g, jnp.float32(-1e30), jnp.float32(0.0))
    base = scores + pen + jnp.float32(margin)     # diag cells clamp to exactly 0

    # ---- caption-retrieval cost: compute and reduce immediately -------------
    cost_s = jnp.maximum(base - d1, 0.0)          # (tm, tn)
    if max_violation:
        row_acc[...] = jnp.maximum(row_acc[...],
                                   jnp.max(cost_s, axis=1, keepdims=True))
    else:
        row_acc[...] += jnp.sum(cost_s, axis=1, keepdims=True)

    # ---- image-retrieval cost (cost_s is dead by now) ------------------------
    cost_im = jnp.maximum(base - d2, 0.0)         # (tm, tn)
    if max_violation:
        col_acc[j] = jnp.maximum(col_acc[j],
                                 jnp.max(cost_im, axis=0, keepdims=True))
    else:
        # total sum does not care about attribution; fold into the row sums
        row_acc[...] += jnp.sum(cost_im, axis=1, keepdims=True)

    # ---- finalize -------------------------------------------------------------
    @pl.when(j == last_j)
    def _():
        out_ref[...] = out_ref[...] + jnp.sum(row_acc[...])

    if max_violation:
        @pl.when(jnp.logical_and(i == last_i, j == last_j))
        def _():
            out_ref[...] = out_ref[...] + jnp.sum(col_acc[...])


def _pick_tile(n, cap=256):
    """Largest power-of-two tile <= cap that divides n, else one full block."""
    for c in (512, 256, 128, 64, 32, 16, 8):
        if c <= cap and n % c == 0:
            return c
    return n  # full-extent block is always legal


def triplet_loss(img, txt, txt_lens=None, *, margin=0.0, max_violation=False,
                 block=256):
    """Pallas implementation of TripletLoss.forward.

    img: [N, D], txt: [N, D]; txt_lens unused (API parity with the PyTorch
    module).  Returns (loss_scalar, [1, 1]) exactly like the reference.
    """
    del txt_lens  # unused in the reference forward pass
    n, d = img.shape
    assert txt.shape == (n, d)

    # Pad the feature dim to a multiple of 128 for lane-dense loads / full MXU
    # column occupancy.  Zero padding changes neither the scores nor the diag.
    if d % 128:
        pad = 128 - (d % 128)
        img = jnp.pad(img, ((0, 0), (0, pad)))
        txt = jnp.pad(txt, ((0, 0), (0, pad)))
    dp = img.shape[1]

    tile = _pick_tile(n, block)
    n_blk = n // tile

    kernel = functools.partial(_triplet_loss_kernel,
                               margin=float(margin),
                               max_violation=bool(max_violation))

    spec_i = pl.BlockSpec((tile, dp), lambda i, j: (i, 0))   # rows of block i
    spec_j = pl.BlockSpec((tile, dp), lambda i, j: (j, 0))   # rows of block j

    itemsize = img.dtype.itemsize
    cost = pl.CostEstimate(flops=2 * n * n * dp,
                           transcendentals=0,
                           bytes_accessed=2 * n * dp * itemsize + 4)

    out = pl.pallas_call(
        kernel,
        out_shape=jax.ShapeDtypeStruct((1, 1), jnp.float32),
        grid_spec=pltpu.PrefetchScalarGridSpec(
            num_scalar_prefetch=0,
            grid=(n_blk, n_blk),
            in_specs=[spec_i,   # img rows i  (matmul LHS, d1)
                      spec_j,   # txt rows j  (matmul RHS, d2)
                      spec_i,   # txt rows i  (d1)
                      spec_j],  # img rows j  (d2)
            out_specs=pl.BlockSpec((1, 1), lambda i, j: (0, 0)),
            scratch_shapes=[
                pltpu.VMEM((tile, 1), jnp.float32),          # per-row accumulator
                pltpu.VMEM((n_blk, 1, tile), jnp.float32),   # per-column running max
            ],
        ),
        compiler_params=pltpu.CompilerParams(
            dimension_semantics=("arbitrary", "arbitrary")),
        cost_estimate=cost,
    )(img, txt, txt, img)

    return out[0, 0], [1, 1]


if __name__ == "__main__":
    key = jax.random.PRNGKey(0)
    k_img, k_txt = jax.random.split(key)

    N, D = 256, 128  # small batch of image/text embedding pairs
    img = jax.random.normal(k_img, (N, D), dtype=jnp.float32)
    txt = jax.random.normal(k_txt, (N, D), dtype=jnp.float32)
    txt_lens = jnp.full((N,), D, dtype=jnp.int32)  # unused, parity with torch API

    # block=128 -> 2x2 grid: exercises diagonal tiles, off-diagonal tiles and
    # the cross-block accumulators.
    loss_sum, flags = triplet_loss(img, txt, txt_lens, margin=0.0,
                                   max_violation=False, block=128)
    loss_sum_m, _ = triplet_loss(img, txt, txt_lens, margin=0.2,
                                 max_violation=False, block=128)
    loss_max, _ = triplet_loss(img, txt, txt_lens, margin=0.2,
                               max_violation=True, block=128)
    jax.block_until_ready(loss_sum)
    jax.block_until_ready(loss_sum_m)
    jax.block_until_ready(loss_max)

    # pure-JAX reference mirroring the PyTorch module
    def ref_loss(img, txt, margin, max_violation):
        scores = jnp.dot(img, txt.T, precision=lax.Precision.HIGHEST)
        diag = jnp.diag(scores)[:, None]
        eye = jnp.eye(scores.shape[0], dtype=bool)
        cs = jnp.where(eye, 0.0, jnp.maximum(margin + scores - diag, 0.0))
        ci = jnp.where(eye, 0.0, jnp.maximum(margin + scores - diag.T, 0.0))
        if max_violation:
            return jnp.sum(jnp.max(cs, axis=1)) + jnp.sum(jnp.max(ci, axis=0))
        return jnp.sum(cs) + jnp.sum(ci)

    ref_sum = ref_loss(img, txt, 0.0, False)
    ref_sum_m = ref_loss(img, txt, 0.2, False)
    ref_max = ref_loss(img, txt, 0.2, True)

    assert flags == [1, 1]
    assert jnp.allclose(loss_sum, ref_sum, rtol=2e-3, atol=1e-2), (loss_sum, ref_sum)
    assert jnp.allclose(loss_sum_m, ref_sum_m, rtol=2e-3, atol=1e-2), (loss_sum_m, ref_sum_m)
    assert jnp.allclose(loss_max, ref_max, rtol=2e-3, atol=1e-2), (loss_max, ref_max)

    print("KERNEL_OK")
</pallas_src>

<mosaic_0001>
module attributes {stable_mosaic.version = 11 : i64} {
  func.func @_triplet_loss_kernel(%arg0: i32, %arg1: i32, %arg2: memref<128x128xf32, #tpu.memory_space<vmem>>, %arg3: memref<128x128xf32, #tpu.memory_space<vmem>>, %arg4: memref<128x128xf32, #tpu.memory_space<vmem>>, %arg5: memref<128x128xf32, #tpu.memory_space<vmem>>, %arg6: memref<1x1xf32, #tpu.memory_space<vmem>>, %arg7: memref<128x1xf32, #tpu.memory_space<vmem>>, %arg8: memref<2x1x128xf32, #tpu.memory_space<vmem>>) attributes {dimension_semantics = [#tpu.dimension_semantics<arbitrary>, #tpu.dimension_semantics<arbitrary>], iteration_bounds = array<i64: 2, 2>, scalar_prefetch = 0 : i64, scratch_operands = 2 : i64, tpu.core_type = #tpu.core_type<tc>, window_params = [{transform_indices = @transform_0, window_bounds = array<i64: 128, 128>}, {transform_indices = @transform_1, window_bounds = array<i64: 128, 128>}, {transform_indices = @transform_2, window_bounds = array<i64: 128, 128>}, {transform_indices = @transform_3, window_bounds = array<i64: 128, 128>}, {pipeline_mode = #tpu.pipeline_mode<synchronous>, transform_indices = @transform_4, window_bounds = array<i64: 1, 1>}]} {
    %c0_i32 = arith.constant 0 : i32
    %0 = arith.cmpi eq, %arg0, %c0_i32 : i32
    %c0_i32_0 = arith.constant 0 : i32
    %1 = arith.cmpi eq, %arg1, %c0_i32_0 : i32
    %2 = arith.andi %0, %1 : i1
    %3 = arith.extui %2 : i1 to i32
    %c0_i32_1 = arith.constant 0 : i32
    %4 = arith.cmpi ne, %3, %c0_i32_1 : i32
    scf.if %4 {
      %cst_30 = arith.constant 0.000000e+00 : f32
      %56 = vector.broadcast %cst_30 : f32 to vector<1x1xf32>
      %c0_31 = arith.constant 0 : index
      %c0_32 = arith.constant 0 : index
      %57 = vector.load %arg6[%c0_31, %c0_32] : memref<1x1xf32, #tpu.memory_space<vmem>>, vector<1x1xf32>
      tpu.vector_store %arg6[%c0_31, %c0_32], %56 {strides = array<i32>} : memref<1x1xf32, #tpu.memory_space<vmem>>, vector<1x1xf32>,
    } else {
    }
    %c0_i32_2 = arith.constant 0 : i32
    %5 = arith.cmpi eq, %arg1, %c0_i32_2 : i32
    %6 = arith.extui %5 : i1 to i32
    %c0_i32_3 = arith.constant 0 : i32
    %7 = arith.cmpi ne, %6, %c0_i32_3 : i32
    scf.if %7 {
      %cst_30 = arith.constant 0.000000e+00 : f32
      %56 = vector.broadcast %cst_30 : f32 to vector<128x1xf32>
      %c0_31 = arith.constant 0 : index
      %c0_32 = arith.constant 0 : index
      %57 = vector.load %arg7[%c0_31, %c0_32] : memref<128x1xf32, #tpu.memory_space<vmem>>, vector<128x1xf32>
      tpu.vector_store %arg7[%c0_31, %c0_32], %56 {strides = array<i32>} : memref<128x1xf32, #tpu.memory_space<vmem>>, vector<128x1xf32>,
    } else {
    }
    %c0 = arith.constant 0 : index
    %c0_4 = arith.constant 0 : index
    %8 = vector.load %arg2[%c0, %c0_4] : memref<128x128xf32, #tpu.memory_space<vmem>>, vector<128x128xf32>
    %c0_5 = arith.constant 0 : index
    %c0_6 = arith.constant 0 : index
    %9 = vector.load %arg3[%c0_5, %c0_6] : memref<128x128xf32, #tpu.memory_space<vmem>>, vector<128x128xf32>
    %cst = arith.constant dense<0.000000e+00> : vector<128x128xf32>
    %10 = tpu.matmul %8, %9, %cst {dimension_numbers = #tpu.dot_dimension_numbers<[1], [1], [0], [0], [0, 0, 1, 0], [], []>} : vector<128x128xf32>, vector<128x128xf32>, vector<128x128xf32> -> vector<128x128xf32>
    %c0_7 = arith.constant 0 : index
    %c0_8 = arith.constant 0 : index
    %11 = vector.load %arg4[%c0_7, %c0_8] : memref<128x128xf32, #tpu.memory_space<vmem>>, vector<128x128xf32>
    %12 = arith.mulf %8, %11 : vector<128x128xf32>
    %cst_9 = arith.constant dense<0.000000e+00> : vector<128xf32>
    %13 = vector.multi_reduction <add>, %12, %cst_9 [1] : vector<128x128xf32> to vector<128xf32>
    %14 = vector.shape_cast %13 : vector<128xf32> to vector<128x1xf32>
    %c0_10 = arith.constant 0 : index
    %c0_11 = arith.constant 0 : index
    %15 = vector.load %arg5[%c0_10, %c0_11] : memref<128x128xf32, #tpu.memory_space<vmem>>, vector<128x128xf32>
    %16 = arith.mulf %15, %9 : vector<128x128xf32>
    %cst_12 = arith.constant dense<0.000000e+00> : vector<128xf32>
    %17 = vector.multi_reduction <add>, %16, %cst_12 [1] : vector<128x128xf32> to vector<128xf32>
    %18 = vector.shape_cast %17 : vector<128xf32> to vector<128x1xf32>
    %19 = tpu.transpose %18, [1, 0] : vector<128x1xf32> -> vector<1x128xf32>
    %c128_i32 = arith.constant 128 : i32
    %20 = arith.muli %arg0, %c128_i32 : i32
    %21 = tpu.iota {dimensions = array<i32: 0>} : vector<128x128xi32>
    %22 = vector.broadcast %20 : i32 to vector<128x128xi32>
    %23 = arith.addi %22, %21 : vector<128x128xi32>
    %c128_i32_13 = arith.constant 128 : i32
    %24 = arith.muli %arg1, %c128_i32_13 : i32
    %25 = tpu.iota {dimensions = array<i32: 1>} : vector<128x128xi32>
    %26 = vector.broadcast %24 : i32 to vector<128x128xi32>
    %27 = arith.addi %26, %25 : vector<128x128xi32>
    %28 = arith.cmpi eq, %23, %27 : vector<128x128xi32>
    %cst_14 = arith.constant -1.000000e+30 : f32
    %cst_15 = arith.constant 0.000000e+00 : f32
    %29 = vector.broadcast %cst_14 : f32 to vector<128x128xf32>
    %30 = vector.broadcast %cst_15 : f32 to vector<128x128xf32>
    %31 = arith.select %28, %29, %30 : vector<128x128xi1>, vector<128x128xf32>
    %32 = arith.addf %10, %31 : vector<128x128xf32>
    %cst_16 = arith.constant 0.000000e+00 : f32
    %33 = vector.broadcast %cst_16 : f32 to vector<128x128xf32>
    %34 = arith.addf %32, %33 : vector<128x128xf32>
    %35 = vector.broadcast %14 : vector<128x1xf32> to vector<128x128xf32>
    %36 = arith.subf %34, %35 : vector<128x128xf32>
    %cst_17 = arith.constant 0.000000e+00 : f32
    %37 = vector.broadcast %cst_17 : f32 to vector<128x128xf32>
    %38 = arith.maximumf %36, %37 : vector<128x128xf32>
    %c0_18 = arith.constant 0 : index
    %c0_19 = arith.constant 0 : index
    %39 = vector.load %arg7[%c0_18, %c0_19] : memref<128x1xf32, #tpu.memory_space<vmem>>, vector<128x1xf32>
    %cst_20 = arith.constant dense<0.000000e+00> : vector<128xf32>
    %40 = vector.multi_reduction <add>, %38, %cst_20 [1] : vector<128x128xf32> to vector<128xf32>
    %41 = vector.shape_cast %40 : vector<128xf32> to vector<128x1xf32>
    %42 = arith.addf %39, %41 : vector<128x1xf32>
    %c0_21 = arith.constant 0 : index
    %c0_22 = arith.constant 0 : index
    %43 = vector.load %arg7[%c0_21, %c0_22] : memref<128x1xf32, #tpu.memory_space<vmem>>, vector<128x1xf32>
    tpu.vector_store %arg7[%c0_21, %c0_22], %42 {strides = array<i32>} : memref<128x1xf32, #tpu.memory_space<vmem>>, vector<128x1xf32>,
    %44 = vector.broadcast %19 : vector<1x128xf32> to vector<128x128xf32>
    %45 = arith.subf %34, %44 : vector<128x128xf32>
    %cst_23 = arith.constant 0.000000e+00 : f32
    %46 = vector.broadcast %cst_23 : f32 to vector<128x128xf32>
    %47 = arith.maximumf %45, %46 : vector<128x128xf32>
    %c0_24 = arith.constant 0 : index
    %c0_25 = arith.constant 0 : index
    %48 = vector.load %arg7[%c0_24, %c0_25] : memref<128x1xf32, #tpu.memory_space<vmem>>, vector<128x1xf32>
    %cst_26 = arith.constant dense<0.000000e+00> : vector<128xf32>
    %49 = vector.multi_reduction <add>, %47, %cst_26 [1] : vector<128x128xf32> to vector<128xf32>
    %50 = vector.shape_cast %49 : vector<128xf32> to vector<128x1xf32>
    %51 = arith.addf %48, %50 : vector<128x1xf32>
    %c0_27 = arith.constant 0 : index
    %c0_28 = arith.constant 0 : index
    %52 = vector.load %arg7[%c0_27, %c0_28] : memref<128x1xf32, #tpu.memory_space<vmem>>, vector<128x1xf32>
    tpu.vector_store %arg7[%c0_27, %c0_28], %51 {strides = array<i32>} : memref<128x1xf32, #tpu.memory_space<vmem>>, vector<128x1xf32>,
    %c1_i32 = arith.constant 1 : i32
    %53 = arith.cmpi eq, %arg1, %c1_i32 : i32
    %54 = arith.extui %53 : i1 to i32
    %c0_i32_29 = arith.constant 0 : i32
    %55 = arith.cmpi ne, %54, %c0_i32_29 : i32
    scf.if %55 {
      %c0_30 = arith.constant 0 : index
      %c0_31 = arith.constant 0 : index
      %56 = vector.load %arg6[%c0_30, %c0_31] : memref<1x1xf32, #tpu.memory_space<vmem>>, vector<1x1xf32>
      %c0_32 = arith.constant 0 : index
      %c0_33 = arith.constant 0 : index
      %57 = vector.load %arg7[%c0_32, %c0_33] : memref<128x1xf32, #tpu.memory_space<vmem>>, vector<128x1xf32>
      %58 = vector.shape_cast %57 : vector<128x1xf32> to vector<1x128x1xf32>
      %cst_34 = arith.constant dense<0.000000e+00> : vector<1xf32>
      %59 = vector.multi_reduction <add>, %58, %cst_34 [1, 2] : vector<1x128x1xf32> to vector<1xf32>
      %60 = vector.shape_cast %59 : vector<1xf32> to vector<1x1x1xf32>
      %61 = vector.extract %60[0, 0, 0] : f32 from vector<1x1x1xf32>
      %62 = vector.broadcast %61 : f32 to vector<1x1xf32>
      %63 = arith.addf %56, %62 : vector<1x1xf32>
      %c0_35 = arith.constant 0 : index
      %c0_36 = arith.constant 0 : index
      %64 = vector.load %arg6[%c0_35, %c0_36] : memref<1x1xf32, #tpu.memory_space<vmem>>, vector<1x1xf32>
      tpu.vector_store %arg6[%c0_35, %c0_36], %63 {strides = array<i32>} : memref<1x1xf32, #tpu.memory_space<vmem>>, vector<1x1xf32>,
    } else {
    }
    return
  }
  func.func @transform_0(%arg0: i32, %arg1: i32) -> (i32, i32) {
    %c0_i32 = arith.constant 0 : i32
    %c0_i32_0 = arith.constant 0 : i32
    return %arg0, %c0_i32 : i32, i32
  }
  func.func @transform_1(%arg0: i32, %arg1: i32) -> (i32, i32) {
    %c0_i32 = arith.constant 0 : i32
    %c0_i32_0 = arith.constant 0 : i32
    return %arg1, %c0_i32 : i32, i32
  }
  func.func @transform_2(%arg0: i32, %arg1: i32) -> (i32, i32) {
    %c0_i32 = arith.constant 0 : i32
    %c0_i32_0 = arith.constant 0 : i32
    return %arg0, %c0_i32 : i32, i32
  }
  func.func @transform_3(%arg0: i32, %arg1: i32) -> (i32, i32) {
    %c0_i32 = arith.constant 0 : i32
    %c0_i32_0 = arith.constant 0 : i32
    return %arg1, %c0_i32 : i32, i32
  }
  func.func @transform_4(%arg0: i32, %arg1: i32) -> (i32, i32) {
    %c0_i32 = arith.constant 0 : i32
    %c0_i32_0 = arith.constant 0 : i32
    %c0_i32_1 = arith.constant 0 : i32
    return %c0_i32, %c0_i32_0 : i32, i32
  }
}

</mosaic_0001>

<bundles_post_ra>
// kernel: tpu_custom_call.1
= control target key start
LH: loop header
LB: loop body
LE: loop exit
PB: predicated region body
PF: predicated region fallthrough
CT: control target
= control target key end

     0   :  { %s2432_s0 = inlined_call_operand.hbm [shape: f32[256,128], index: 0, kind: input, shape index: {}]   ;;  %s2433_s1 = inlined_call_operand.hbm [shape: f32[256,128], index: 1, kind: input, shape index: {}]   ;;  %s2434_s2 = inlined_call_operand.hbm [shape: f32[256,128], index: 2, kind: input, shape index: {}]   ;;  %s2435_s3 = inlined_call_operand.hbm [shape: f32[256,128], index: 3, kind: input, shape index: {}]   ;;  %s2436_s4 = inlined_call_operand.hbm [shape: f32[1,1], index: 4, kind: output, shape index: {}]  }
   0x1   :  { %2452 = sst [smem:[#allocation25_spill]] %s2432_s0 }
   0x2   :  { %2453 = sst [smem:[#allocation26_spill]] %s2433_s1 }
   0x3   :  { %2454 = sst [smem:[#allocation27_spill]] %s2436_s4 }
   0x4   :  { %9 = vsyncpa [#allocation5], 0 }
   0x5   :  { %11 = vsyncpa [#allocation5 + $0x1], 0 }
   0x6   :  { %12 = vsyncpa [#allocation8], 0 }
   0x7   :  { %14 = vsyncpa [#allocation8 + $0x1], 0 }
   0x8   :  { %15 = vsyncpa [#allocation11], 0 }
   0x9   :  { %17 = vsyncpa [#allocation11 + $0x1], 0 }
   0xa   :  { %18 = vsyncpa [#allocation6], 0  ;;  %s1774_s15 = smov 0   ;;  %s1776_s16 = smov 0  }
   0xb   :  { %s1778_s17 = smov 0   ;;  %s1780_s18 = smov 0  }
   0xc   :  { %s1782_s19 = smov 0   ;;  %s1784_s20 = smov 0  }
   0xd   :  { %s1786_s21 = smov 0   ;;  %s1788_s22 = smov 0  }
   0xe   :  { %s1790_s23 = smov 0   ;;  %s1792_s24 = smov 0  }
   0xf   :  { %s1794_s25 = smov 0  }
  0x10 LB: > { %2455 = sst [smem:[#allocation18_spill]] %s1721_s21  ;;  %s1828_s26 = sadd.s32 4294967295, %s1737_s25   ;;  %s1737_s25 = sphi %s1794_s25, %s24_s25   ;;  %s1733_s24 = sphi %s1792_s24, %s2487_s24   ;;  %s1729_s23 = sphi %s1790_s23, %s2495_s23   ;;  %s1725_s22 = sphi %s1788_s22, %s2485_s22   ;;  %s1721_s21 = sphi %s1786_s21, %s2494_s21   ;;  %s1717_s20 = sphi %s1784_s20, %s2493_s20   ;;  %s1713_s19 = sphi %s1782_s19, %s2492_s19   ;;  %s1709_s18 = sphi %s1780_s18, %s2491_s18   ;;  %s1705_s17 = sphi %s1778_s17, %s2490_s17   ;;  %s1701_s16 = sphi %s1776_s16, %s2489_s16   ;;  %s1697_s15 = sphi %s1774_s15, %s2488_s15  }
  0x11   : > { %2456 = sst [smem:[#allocation19_spill]] %s1725_s22  ;;  %s33_s27 = sadd.s32 1, %s1729_s23 }
  0x12   : > { %2457 = sst [smem:[#allocation20_spill]] %s1733_s24  ;;  %p1831_p0 = scmp.ge.s32.totalorder %s33_s27, 2 }
  0x13   : > { %p51_p1 = scmp.eq.s32.totalorder %s1737_s25, 0  ;;  %p2439_p2 = scmp.eq.s32.totalorder %s1828_s26, 0 }
  0x14   : > { %s69_s29 = sadd.s32 1, %s1705_s17  ;;  %s2497_s27 = smov (%p1831_p0, %s33_s27), 0 }
  0x15   : > { %2459 = sst [smem:[#allocation21_spill]] %s2497_s27  ;;  %p76_p3 = scmp.ne.s32.totalorder %s1705_s17, %s1701_s16 }
  0x16   : > { %p82_p4 = scmp.ne.s32.totalorder %s1701_s16, %s1697_s15  ;;  %s66_s30 = ssub.s32 %s1729_s23, %s2497_s27 }
  0x17   : > { %p67_p5 = scmp.eq.s32.totalorder %s66_s30, 0  ;;  %p78_p6 = por %p76_p3, %p51_p1 }
  0x18   : > { %p1851_p7 = por %p82_p4, %p2439_p2  ;;  %p2438_p8 = scmp.lt.s32.totalorder %s1737_s25, 4 }
  0x19   : > { %s1857_s6 = scalar_select %p67_p5, %s1705_s17, %s69_s29  }
  0x1a   : > { %s2460_s5 = scalar_select %p1851_p7, 1, 0 }
  0x1b   : > { %2462 = sst [smem:[#allocation23_spill]] %s1857_s6  ;;  %s200_s7 = sand.u32 1, %s1737_s25  }
  0x1c   : > { %2461 = sst [smem:[#allocation22_spill]] %s2460_s5  ;;  %s2437_s8 = sand.u32 1, %s1705_s17  }
  0x1d   : > { %s1863_s9 = sshll.u32 %s2437_s8, 7  ;;  %s2440_s10 = sshll.u32 %s1729_s23, 11 }
  0x1e   : > { %s2463_s1 = sld [smem:[#allocation26_spill]]  ;;  %s204_s14 = scalar_lea.vmem [#allocation7], %s1863_s9 }
  0x1f   : > { %s211_s15 = sshll.u32 %s204_s14, 4  ;;  %p1874_p9 = pnand %p2438_p8, %p78_p6  ;;  %s212_s15 = int_to_ptr.vmem [resolvable:$true] %s211_s15 }
  0x20   : > { %p1234_p10 = scmp.ge.s32.totalorder %s1737_s25, 1  ;;  %p261_p11 = scmp.lt.s32.totalorder %s1737_s25, 5 }
  0x21   : > { %s1880_s29 = scalar_lea.sflag [#allocation8], %s200_s7  ;;  %p2451_p12 = pneg %p1874_p9 }
  0x22   : > { %s1508_s8 = scalar_lea.vmem %s212_s15, 2048  ;;  %s1739_s11 = smov [#allocation7]  }
  0x23   : > { %p1509_p13 = scmp.ne.s32.totalorder %s212_s15, %s1508_s8  ;;  %s1513_s12 = sshll.u32 %s1739_s11, 4  ;;  %s1514_s12 = int_to_ptr.vmem [resolvable:$false] %s1513_s12 }
  0x24   : > { %s210_s13 = scalar_lea.hbm %s2463_s1, %s2440_s10  ;;  %s1515_s14 = scalar_lea.vmem %s1514_s12, 4096 }
  0x25   : > { %p1511_p3 = pnand %p1509_p13, %p2451_p12  ;;  %p1516_p5 = scmp.lt.s32.totalorder %s212_s15, %s1514_s12 }
  0x26   : > { %p1517_p6 = scmp.lt.s32.totalorder %s1515_s14, %s1508_s8 }
  0x27   : > { %p1512_p4 = pneg %p1511_p3 }
  0x28   : > { %p1518_p8 = por %p1517_p6, %p1516_p5 }
  0x2a   : > { %p1519_p2 = pnand %p1518_p8, %p1512_p4 }
  0x2c   : > { %1522 = shalt.err (!%p1519_p2)
}
  0x2d   : > { %s2441_s10 = smov 128   ;;  %s2443_s7 = smov 8  }
  0x2e   : > { %1391 = dma.hbm_to_vmem [thread:$0]  (!%p1874_p9), %s210_s13, 2048, %s212_s15, %s1880_s29, %s2441_s10, %s2441_s10, %s2443_s7  }
  0x2f   : > { %p1897_p2 = pnand %p1234_p10, %p261_p11  ;;  %s36_s11 = sadd.s32 1, %s1733_s24 }
  0x30   : > { %s43_s12 = sadd.s32 1, %s1717_s20  ;;  %s2499_s11 = smov (!%p1831_p0, %s36_s11), %s1733_s24 }
  0x31   : > { %p50_p8 = scmp.ne.s32.totalorder %s1717_s20, %s1713_s19  ;;  %p56_p13 = scmp.ne.s32.totalorder %s1713_s19, %s1709_s18 }
  0x32   : > { %p38_p3 = scmp.ge.s32.totalorder %s2499_s11, 2  ;;  %s179_s14 = sand.u32 1, %s1717_s20  }
  0x33   : > { %p52_p4 = por %p51_p1, %p50_p8  ;;  %p2466_p5 = scmp.eq.s32.totalorder %s1828_s26, 0 }
  0x34   : > { %s2501_s11 = smov (%p38_p3, %s2499_s11), 0  ;;  %s1222_s15 = sshll.u32 %s179_s14, 7 }
  0x35   : > { %p1915_p6 = por %p2466_p5, %p56_p13  ;;  %2468 = sst [smem:[#allocation24_spill]] %s2501_s11 }
  0x36   : > { %s40_s10 = ssub.s32 %s1733_s24, %s2501_s11  ;;  %s1247_s28 = sshll.u32 %s1733_s24, 11 }
  0x37   : > { %p41_p10 = scmp.eq.s32.totalorder %s40_s10, 0  ;;  %s2469_s0 = sld [smem:[#allocation25_spill]] }
  0x38   : > { %s183_s27 = scalar_lea.vmem [#allocation4], %s1222_s15  ;;  %p2470_p0 = scmp.lt.s32.totalorder %s1737_s25, 4 }
  0x39   : > { %s190_s6 = sshll.u32 %s183_s27, 4  ;;  %s1939_s10 = scalar_lea.hbm %s2434_s2, %s1247_s28  ;;  %s191_s6 = int_to_ptr.vmem [resolvable:$true] %s190_s6 }
  0x3a   : > { %s1928_s4 = scalar_select %p41_p10, %s1717_s20, %s43_s12  }
  0x3b   : > { %p1932_p1 = pnand %p2470_p0, %p52_p4  ;;  %s225_s11 = scalar_lea.vmem [#allocation9], %s1222_s15 }
  0x3c   : > { %s232_s1 = sshll.u32 %s225_s11, 4  ;;  %s180_s7 = scalar_lea.sflag [#allocation5], %s179_s14  ;;  %s233_s1 = int_to_ptr.vmem [resolvable:$true] %s232_s1 }
  0x3d   : > { %s189_s18 = scalar_lea.hbm %s2469_s0, %s1247_s28  ;;  %p1525_p11 = pneg %p1932_p1 }
  0x3e   : > { %s1536_s27 = scalar_lea.vmem %s191_s6, 2048  ;;  %s1742_s12 = smov [#allocation4]  }
  0x3f   : > { %p1537_p8 = scmp.ne.s32.totalorder %s191_s6, %s1536_s27  ;;  %s1541_s0 = sshll.u32 %s1742_s12, 4  ;;  %s1542_s0 = int_to_ptr.vmem [resolvable:$false] %s1541_s0 }
  0x40   : > { %s1543_s24 = scalar_lea.vmem %s1542_s0, 4096  ;;  %p1544_p4 = scmp.lt.s32.totalorder %s191_s6, %s1542_s0 }
  0x41   : > { %p1539_p13 = pnand %p1537_p8, %p1525_p11  ;;  %p1545_p5 = scmp.lt.s32.totalorder %s1543_s24, %s1536_s27 }
  0x43   : > { %p1540_p3 = pneg %p1539_p13  ;;  %p1546_p10 = por %p1545_p5, %p1544_p4 }
  0x45   : > { %p1547_p0 = pnand %p1546_p10, %p1540_p3 }
  0x47   : > { %1550 = shalt.err (!%p1547_p0)
}
  0x48   : > { %s2472_s22 = smov 8   ;;  %s2473_s5 = smov 128  }
  0x49   : > { %1388 = dma.hbm_to_vmem [thread:$0]  (!%p1932_p1), %s189_s18, 2048, %s191_s6, %s180_s7, %s2473_s5, %s2473_s5, %s2472_s22  }
  0x4a   : > { %s1564_s11 = scalar_lea.vmem %s233_s1, 2048  ;;  %s1743_s14 = smov [#allocation9]  }
  0x4b   : > { %p1565_p8 = scmp.ne.s32.totalorder %s233_s1, %s1564_s11  ;;  %s1569_s0 = sshll.u32 %s1743_s14, 4  ;;  %s1570_s0 = int_to_ptr.vmem [resolvable:$false] %s1569_s0 }
  0x4c   : > { %s1571_s24 = scalar_lea.vmem %s1570_s0, 4096  ;;  %p1572_p3 = scmp.lt.s32.totalorder %s233_s1, %s1570_s0 }
  0x4d   : > { %p1567_p13 = pnand %p1565_p8, %p1525_p11  ;;  %p1573_p4 = scmp.lt.s32.totalorder %s1571_s24, %s1564_s11 }
  0x4f   : > { %p1568_p12 = pneg %p1567_p13  ;;  %p1574_p5 = por %p1573_p4, %p1572_p3 }
  0x51   : > { %p1575_p10 = pnand %p1574_p5, %p1568_p12 }
  0x53   : > { %1578 = shalt.err (!%p1575_p10)
}
  0x54   : > { %1394 = dma.hbm_to_vmem [thread:$0]  (!%p1932_p1), %s1939_s10, 2048, %s233_s1, %s1880_s29, %s2473_s5, %s2473_s5, %s2472_s22  }
  0x55   : > { %s2474_s6 = sshll.u32 %s1729_s23, 11  ;;  %s246_s7 = scalar_lea.vmem [#allocation10], %s1863_s9 }
  0x56   : > { %s252_s18 = scalar_lea.hbm %s2435_s3, %s2474_s6  ;;  %s253_s27 = sshll.u32 %s246_s7, 4  ;;  %s254_s27 = int_to_ptr.vmem [resolvable:$true] %s253_s27 }
  0x57   : > { %s2475_s12 = sand.u32 1, %s1705_s17   ;;  %s1592_s11 = scalar_lea.vmem %s254_s27, 2048 }
  0x58   : > { %s243_s21 = scalar_lea.sflag [#allocation11], %s2475_s12  ;;  %p1593_p12 = scmp.ne.s32.totalorder %s254_s27, %s1592_s11 }
  0x59   : > { %p2476_p11 = pneg %p1874_p9  ;;  %s1744_s14 = smov [#allocation10]  }
  0x5a   : > { %s1597_s0 = sshll.u32 %s1744_s14, 4  ;;  %s1598_s0 = int_to_ptr.vmem [resolvable:$false] %s1597_s0 }
  0x5b   : > { %p1595_p0 = pnand %p1593_p12, %p2476_p11  ;;  %s1599_s29 = scalar_lea.vmem %s1598_s0, 4096 }
  0x5c   : > { %p1600_p1 = scmp.lt.s32.totalorder %s254_s27, %s1598_s0  ;;  %p1601_p13 = scmp.lt.s32.totalorder %s1599_s29, %s1592_s11 }
  0x5d   : > { %p1596_p8 = pneg %p1595_p0 }
  0x5e   : > { %p1602_p3 = por %p1601_p13, %p1600_p1 }
  0x60   : > { %p1603_p4 = pnand %p1602_p3, %p1596_p8 }
  0x62   : > { %1606 = shalt.err (!%p1603_p4)
}
  0x63   : > { %1397 = dma.hbm_to_vmem [thread:$0]  (!%p1874_p9), %s252_s18, 2048, %s254_s27, %s243_s21, %s2473_s5, %s2473_s5, %s2472_s22  }
  0x64   : > { %265 = sbr.rel (%p1897_p2) target bundleno = 936 (0x3a8), region = 36  ;;  %s267_s9 = sand.u32 (!%p1897_p2), 1, %s1713_s19  }
  0x65   : > { %s1235_s10 = sshll.u32 (!%p1897_p2), %s267_s9, 7  ;;  %s268_s1 = scalar_lea.sflag (!%p1897_p2), [#allocation5], %s267_s9 }
  0x66   : > { %s1980_s24 = scalar_lea.vmem (!%p1897_p2), [#allocation4], %s1235_s10 }
  0x69   : > { %1676 = dma.done.wait (%p1915_p6), %s268_s1, 2048  }
  0x6a   : > { %1678 = vsyncadd (%p1915_p6), %s268_s1, 4294965248  ;;  %s276_s6 = sand.u32 1, %s1828_s26   ;;  %s278_s22 = sand.u32 1, %s1701_s16  }
  0x6b   : > { %s1236_s5 = sshll.u32 %s278_s22, 7  ;;  %s277_s8 = scalar_lea.sflag [#allocation8], %s276_s6 }
  0x6c   : > { %s1988_s15 = scalar_lea.vmem [#allocation7], %s1236_s5 }
  0x6d   : > { %1680 = dma.done.wait (%p1851_p7), %s277_s8, 2048  }
  0x6e   : > { %1682 = vsyncadd (%p1851_p7), %s277_s8, 4294965248  ;;  %s1994_s28 = scalar_lea.vmem [#allocation9], %s1235_s10 }
  0x6f   : > { %1684 = dma.done.wait (%p1915_p6), %s277_s8, 2048  }
  0x70   : > { %1686 = vsyncadd (%p1915_p6), %s277_s8, 4294965248  ;;  %s295_s18 = scalar_lea.sflag [#allocation11], %s278_s22  ;;  %s2000_s7 = scalar_lea.vmem [#allocation10], %s1236_s5 }
  0x71   : > { %1688 = dma.done.wait (%p1851_p7), %s295_s18, 2048  }
  0x72   : > { %1690 = vsyncadd (%p1851_p7), %s295_s18, 4294965248  ;;  %s2478_s27 = sld [smem:[#allocation19_spill]] }
  0x73   : > { %s2479_s12 = sld [smem:[#allocation18_spill]] }
  0x78   : > { %p337_p9 = scmp.eq.s32.totalorder %s2478_s27, 0 }
  0x79   : > { %p338_p2 = scmp.eq.s32.totalorder %s2479_s12, 0 }
  0x7b   : > { %p339_p5 = pnand %p338_p2, %p337_p9 }
  0x7d   : > { %342 = sbr.rel (%p339_p5) target bundleno = 132 (0x84), region = 56 }
  0x82   : > { %vm343_vm0 = vcmask 0   ;;  %v1745_v0 = vmov 0.0  }
  0x83   : > { %344 = vst.msk [vmem:[#allocation12] sm:$0x1] %vm343_vm0, %v1745_v0 }
  0x84 PF: > { %s2480_s13 = sld [smem:[#allocation18_spill]] }
  0x8a   : > { %p1239_p6 = scmp.ne.s32.totalorder %s2480_s13, 0 }
  0x8c   : > { %347 = sbr.rel (%p1239_p6) target bundleno = 154 (0x9a), region = 60 }
  0x91   : > { %vm348_vm1 = vcmask 7168   ;;  %v1746_v1 = vmov 0.0  }
  0x92   : > { %349 = vst.msk [vmem:[#allocation2] sm:$0xff] %vm348_vm1, %v1746_v1  ;;  %350 = vst.msk [vmem:[#allocation2 + $0x8] sm:$0xff] %vm348_vm1, %v1746_v1 }
  0x93   : > { %351 = vst.msk [vmem:[#allocation2 + $0x10] sm:$0xff] %vm348_vm1, %v1746_v1  ;;  %352 = vst.msk [vmem:[#allocation2 + $0x18] sm:$0xff] %vm348_vm1, %v1746_v1 }
  0x94   : > { %353 = vst.msk [vmem:[#allocation2 + $0x20] sm:$0xff] %vm348_vm1, %v1746_v1  ;;  %354 = vst.msk [vmem:[#allocation2 + $0x28] sm:$0xff] %vm348_vm1, %v1746_v1 }
  0x95   : > { %355 = vst.msk [vmem:[#allocation2 + $0x30] sm:$0xff] %vm348_vm1, %v1746_v1  ;;  %356 = vst.msk [vmem:[#allocation2 + $0x38] sm:$0xff] %vm348_vm1, %v1746_v1 }
  0x96   : > { %357 = vst.msk [vmem:[#allocation2 + $0x40] sm:$0xff] %vm348_vm1, %v1746_v1  ;;  %358 = vst.msk [vmem:[#allocation2 + $0x48] sm:$0xff] %vm348_vm1, %v1746_v1 }
  0x97   : > { %359 = vst.msk [vmem:[#allocation2 + $0x50] sm:$0xff] %vm348_vm1, %v1746_v1  ;;  %360 = vst.msk [vmem:[#allocation2 + $0x58] sm:$0xff] %vm348_vm1, %v1746_v1 }
  0x98   : > { %361 = vst.msk [vmem:[#allocation2 + $0x60] sm:$0xff] %vm348_vm1, %v1746_v1  ;;  %362 = vst.msk [vmem:[#allocation2 + $0x68] sm:$0xff] %vm348_vm1, %v1746_v1 }
  0x99   : > { %363 = vst.msk [vmem:[#allocation2 + $0x70] sm:$0xff] %vm348_vm1, %v1746_v1  ;;  %364 = vst.msk [vmem:[#allocation2 + $0x78] sm:$0xff] %vm348_vm1, %v1746_v1 }
  0x9a PF: > { %v2026_v2 = vld [vmem:[%s1988_s15 + $0x78] sm:$0xff]  ;;  %v2029_v3 = vld [vmem:[%s1988_s15] sm:$0xff]  ;;  %v2036_v6 = vld [vmem:[%s1988_s15 + $0x70] sm:$0xff]  ;;  %s2481_s21 = sld [smem:[#allocation19_spill]] }
  0x9b   : > { %v461_v4 = vld [vmem:[%s2000_s7] sm:$0xff]  ;;  %1283 = vmatprep.subr.mxu0 %v2026_v2  ;;  %1339 = vmatprep.subr.mxu1 %v2026_v2  ;;  %v2039_v7 = vld [vmem:[%s1988_s15 + $0x8] sm:$0xff]  ;;  %v2045_v9 = vld [vmem:[%s1988_s15 + $0x10] sm:$0xff]  ;;  %s2482_s11 = sld [smem:[#allocation18_spill]] }
  0x9c   : > { %v477_v5 = vmul.f32 %v461_v4, %v2029_v3  ;;  %v462_v8 = vld [vmem:[%s2000_s7 + $0x8] sm:$0xff]  ;;  %1284 = vmatpush3.xpose.msra.mxu0 %v2026_v2  ;;  %1355 = vmatpush3.xpose.msra.mxu1 %v2026_v2  ;;  %v463_v10 = vld [vmem:[%s2000_s7 + $0x10] sm:$0xff]  ;;  %v2052_v13 = vld [vmem:[%s1988_s15 + $0x18] sm:$0xff] }
  0x9d   : > { %1285 = vmatprep.subr.mxu0 %v2036_v6  ;;  %v478_v11 = vmul.f32 %v462_v8, %v2039_v7  ;;  %v479_v12 = vmul.f32 %v463_v10, %v2045_v9  ;;  %v464_v14 = vld [vmem:[%s2000_s7 + $0x18] sm:$0xff]  ;;  %1340 = vmatprep.subr.mxu1 %v2036_v6  ;;  %v2057_v15 = vld [vmem:[%s1988_s15 + $0x68] sm:$0xff]  ;;  %v2061_v17 = vld [vmem:[%s1988_s15 + $0x20] sm:$0xff] }
  0x9e   : > { %493 = vadd.xlane.f32.xlu0 %v477_v5  ;;  %v480_v16 = vmul.f32 %v464_v14, %v2052_v13  ;;  %v465_v18 = vld [vmem:[%s2000_s7 + $0x20] sm:$0xff]  ;;  %v2067_v19 = vld [vmem:[%s1988_s15 + $0x28] sm:$0xff]  ;;  %v2076_v24 = vld [vmem:[%s1988_s15 + $0x30] sm:$0xff] }
  0x9f   : > { %497 = vadd.xlane.f32.xlu1 %v479_v12  ;;  %v466_v20 = vld [vmem:[%s2000_s7 + $0x28] sm:$0xff]  ;;  %v393_v21 = vld [vmem:[%s1988_s15 + $0x60] sm:$0xff]  ;;  %v481_v22 = vmul.f32 %v465_v18, %v2061_v17  ;;  %v467_v25 = vld [vmem:[%s2000_s7 + $0x30] sm:$0xff] }
  0xa0   : > { %1286 = vmatpush3.xpose.msra.mxu0 %v2036_v6  ;;  %1356 = vmatpush3.xpose.msra.mxu1 %v2036_v6  ;;  %v482_v23 = vmul.f32 %v466_v20, %v2067_v19  ;;  %v2082_v26 = vld [vmem:[%s1988_s15 + $0x38] sm:$0xff]  ;;  %v365_v28 = vld [vmem:[%s1980_s24] sm:$0xff]  ;;  %v483_v31 = vmul.f32 %v467_v25, %v2076_v24  ;;  %v470_v34 = vld [vmem:[%s2000_s7 + $0x48] sm:$0xff]  ;;  %s1240_s14 = sshll.u32 %s2481_s21, 7 }
  0xa1   : > { %1287 = vmatprep.subr.mxu0 %v2057_v15  ;;  %1341 = vmatprep.subr.mxu1 %v2057_v15  ;;  %v468_v27 = vld [vmem:[%s2000_s7 + $0x38] sm:$0xff]  ;;  %v2087_v29 = vld [vmem:[%s1980_s24 + $0x40] sm:$0xff]  ;;  %v391_v36 = vld [vmem:[%s1988_s15 + $0x50] sm:$0xff]  ;;  %s1241_s0 = sshll.u32 %s2482_s11, 7  ;;  %p1242_p7 = scmp.ne.s32.totalorder %s2482_s11, 1 }
  0xa2   : > { %495 = vadd.xlane.f32.xlu0 %v478_v11  ;;  %v392_v30 = vld [vmem:[%s1988_s15 + $0x58] sm:$0xff]  ;;  %1315 = vmatprep.mubr.f32.mxu0 %v365_v28  ;;  %v484_v32 = vmul.f32 %v468_v27, %v2082_v26  ;;  %v469_v33 = vld [vmem:[%s2000_s7 + $0x40] sm:$0xff]  ;;  %v390_v37 = vld [vmem:[%s1988_s15 + $0x48] sm:$0xff] }
  0xa3   : > { %499 = vadd.xlane.f32.xlu1 %v480_v16  ;;  %1327 = vmatprep.mubr.f32.mxu1 %v2087_v29  ;;  %v389_v35 = vld [vmem:[%s1988_s15 + $0x40] sm:$0xff]  ;;  %v486_v39 = vmul.f32 %v470_v34, %v390_v37  ;;  %v471_v40 = vld [vmem:[%s2000_s7 + $0x50] sm:$0xff]  ;;  %v472_v41 = vld [vmem:[%s2000_s7 + $0x58] sm:$0xff] }
  0xa4   : > { %1288 = vmatpush3.xpose.msra.mxu0 %v2057_v15  ;;  %1357 = vmatpush3.xpose.msra.mxu1 %v2057_v15  ;;  %v485_v38 = vmul.f32 %v469_v33, %v389_v35  ;;  %v487_v42 = vmul.f32 %v471_v40, %v391_v36  ;;  %v488_v43 = vmul.f32 %v472_v41, %v392_v30  ;;  %v473_v44 = vld [vmem:[%s2000_s7 + $0x60] sm:$0xff]  ;;  %v474_v45 = vld [vmem:[%s2000_s7 + $0x68] sm:$0xff]  ;;  %v475_v48 = vld [vmem:[%s2000_s7 + $0x70] sm:$0xff] }
  0xa5   : > { %1289 = vmatprep.subr.mxu0 %v393_v21  ;;  %1342 = vmatprep.subr.mxu1 %v393_v21  ;;  %v489_v46 = vmul.f32 %v473_v44, %v393_v21  ;;  %v490_v47 = vmul.f32 %v474_v45, %v2057_v15  ;;  %v476_v49 = vld [vmem:[%s2000_s7 + $0x78] sm:$0xff]  ;;  %v491_v50 = vmul.f32 %v475_v48, %v2036_v6  ;;  %v397_v52 = vld [vmem:[%s1994_s28] sm:$0xff]  ;;  %v398_v53 = vld [vmem:[%s1994_s28 + $0x8] sm:$0xff] }
  0xa6   : > { %501 = vadd.xlane.f32.xlu0 %v481_v22  ;;  %v492_v51 = vmul.f32 %v476_v49, %v2026_v2  ;;  %v2112_v54 = vld [vmem:[%s1980_s24 + $0x8] sm:$0xff]  ;;  %v413_v55 = vmul.f32 %v397_v52, %v365_v28  ;;  %v399_v56 = vld [vmem:[%s1994_s28 + $0x10] sm:$0xff]  ;;  %v400_v58 = vld [vmem:[%s1994_s28 + $0x18] sm:$0xff] }
  0xa7   : > { %503 = vadd.xlane.f32.xlu1 %v482_v23  ;;  %v414_v57 = vmul.f32 %v398_v53, %v2112_v54  ;;  %v2122_v59 = vld [vmem:[%s1980_s24 + $0x10] sm:$0xff]  ;;  %v2125_v60 = vld [vmem:[%s1980_s24 + $0x18] sm:$0xff]  ;;  %v401_v62 = vld [vmem:[%s1994_s28 + $0x20] sm:$0xff] }
  0xa8   : > { %1290 = vmatpush3.xpose.msra.mxu0 %v393_v21  ;;  %1358 = vmatpush3.xpose.msra.mxu1 %v393_v21  ;;  %v415_v61 = vmul.f32 %v399_v56, %v2122_v59  ;;  %v416_v63 = vmul.f32 %v400_v58, %v2125_v60  ;;  %v402_v0 = vld [vmem:[%s1994_s28 + $0x28] sm:$0xff]  ;;  %v2136_v1 = vld [vmem:[%s1980_s24 + $0x20] sm:$0xff]  ;;  %v403_v5 = vld [vmem:[%s1994_s28 + $0x30] sm:$0xff] }
  0xa9   : > { %1291 = vmatprep.subr.mxu0 %v392_v30  ;;  %1343 = vmatprep.subr.mxu1 %v392_v30  ;;  %v2139_v2 = vld [vmem:[%s1980_s24 + $0x28] sm:$0xff]  ;;  %v417_v4 = vmul.f32 %v401_v62, %v2136_v1  ;;  %v404_v8 = vld [vmem:[%s1994_s28 + $0x38] sm:$0xff]  ;;  %v2150_v10 = vld [vmem:[%s1980_s24 + $0x30] sm:$0xff] }
  0xaa   : > { %505 = vadd.xlane.f32.xlu0 %v483_v31  ;;  %v418_v6 = vmul.f32 %v402_v0, %v2139_v2  ;;  %v2153_v11 = vld [vmem:[%s1980_s24 + $0x38] sm:$0xff]  ;;  %v419_v12 = vmul.f32 %v403_v5, %v2150_v10  ;;  %v405_v14 = vld [vmem:[%s1994_s28 + $0x40] sm:$0xff]  ;;  %v406_v16 = vld [vmem:[%s1994_s28 + $0x48] sm:$0xff]  ;;  %v595_v0 = vstv %s1241_s0 }
  0xab   : > { %507 = vadd.xlane.f32.xlu1 %v484_v32  ;;  %v420_v15 = vmul.f32 %v404_v8, %v2153_v11  ;;  %v374_v18 = vld [vmem:[%s1980_s24 + $0x48] sm:$0xff]  ;;  %v407_v20 = vld [vmem:[%s1994_s28 + $0x50] sm:$0xff]  ;;  %v376_v23 = vld [vmem:[%s1980_s24 + $0x58] sm:$0xff] }
  0xac   : > { %1292 = vmatpush3.xpose.msra.mxu0 %v392_v30  ;;  %1359 = vmatpush3.xpose.msra.mxu1 %v392_v30  ;;  %v422_v21 = vmul.f32 %v406_v16, %v374_v18  ;;  %v375_v22 = vld [vmem:[%s1980_s24 + $0x50] sm:$0xff]  ;;  %v409_v25 = vld [vmem:[%s1994_s28 + $0x60] sm:$0xff]  ;;  %v378_v28 = vld [vmem:[%s1980_s24 + $0x68] sm:$0xff] }
  0xad   : > { %1293 = vmatprep.subr.mxu0 %v391_v36  ;;  %1344 = vmatprep.subr.mxu1 %v391_v36  ;;  %v377_v27 = vld [vmem:[%s1980_s24 + $0x60] sm:$0xff]  ;;  %v411_v30 = vld [vmem:[%s1994_s28 + $0x70] sm:$0xff]  ;;  %v412_v33 = vld [vmem:[%s1994_s28 + $0x78] sm:$0xff] }
  0xae   : > { %509 = vadd.xlane.f32.xlu0 %v485_v38 }
  0xaf   : > { %511 = vadd.xlane.f32.xlu1 %v486_v39 }
  0xb0   : > { %1294 = vmatpush3.xpose.msra.mxu0 %v391_v36  ;;  %1360 = vmatpush3.xpose.msra.mxu1 %v391_v36 }
  0xb1   : > { %1295 = vmatprep.subr.mxu0 %v390_v37  ;;  %1345 = vmatprep.subr.mxu1 %v390_v37 }
  0xb2   : > { %513 = vadd.xlane.f32.xlu0 %v487_v42 }
  0xb3   : > { %515 = vadd.xlane.f32.xlu1 %v488_v43 }
  0xb4   : > { %1296 = vmatpush3.xpose.msra.mxu0 %v390_v37  ;;  %1361 = vmatpush3.xpose.msra.mxu1 %v390_v37 }
  0xb5   : > { %1297 = vmatprep.subr.mxu0 %v389_v35  ;;  %1346 = vmatprep.subr.mxu1 %v389_v35 }
  0xb6   : > { %517 = vadd.xlane.f32.xlu0 %v489_v46 }
  0xb7   : > { %519 = vadd.xlane.f32.xlu1 %v490_v47 }
  0xb8   : > { %1298 = vmatpush3.xpose.msra.mxu0 %v389_v35  ;;  %1362 = vmatpush3.xpose.msra.mxu1 %v389_v35 }
  0xb9   : > { %1299 = vmatprep.subr.mxu0 %v2082_v26  ;;  %1347 = vmatprep.subr.mxu1 %v2082_v26 }
  0xba   : > { %521 = vadd.xlane.f32.xlu0 %v491_v50 }
  0xbb   : > { %523 = vadd.xlane.f32.xlu1 %v492_v51 }
  0xbc   : > { %1300 = vmatpush3.xpose.msra.mxu0 %v2082_v26  ;;  %1363 = vmatpush3.xpose.msra.mxu1 %v2082_v26 }
  0xbd   : > { %1301 = vmatprep.subr.mxu0 %v2076_v24  ;;  %1348 = vmatprep.subr.mxu1 %v2076_v24 }
  0xbe   : > { %429 = vadd.xlane.f32.xlu0 %v413_v55  ;;  %v558_v55 = vlaneseq }
  0xbf   : > { %431 = vadd.xlane.f32.xlu1 %v414_v57 }
  0xc0   : > { %1302 = vmatpush3.xpose.msra.mxu0 %v2076_v24  ;;  %1364 = vmatpush3.xpose.msra.mxu1 %v2076_v24  ;;  %v423_v24 = vmul.f32 %v407_v20, %v375_v22  ;;  %v2208_v57 = vshrl.u32 %v558_v55, 7 }
  0xc1   : > { %1303 = vmatprep.subr.mxu0 %v2067_v19  ;;  %1349 = vmatprep.subr.mxu1 %v2067_v19 }
  0xc2   : > { %433 = vadd.xlane.f32.xlu0 %v415_v61  ;;  %v594_v61 = vand.u32 127, %v558_v55  ;;  %v568_v62 = vadd.s32 72, %v2208_v57  ;;  %v570_v8 = vadd.s32 88, %v2208_v57  ;;  %v562_v20 = vadd.s32 24, %v2208_v57 }
  0xc3   : > { %435 = vadd.xlane.f32.xlu1 %v416_v63  ;;  %v2218_v63 = vstv %s1240_s14 }
  0xc4   : > { %1304 = vmatpush3.xpose.msra.mxu0 %v2067_v19  ;;  %1365 = vmatpush3.xpose.msra.mxu1 %v2067_v19  ;;  %v421_v19 = vmul.f32 %v405_v14, %v2087_v29  ;;  %v425_v29 = vmul.f32 %v409_v25, %v377_v27  ;;  %v585_v5 = vadd.s32 %v2218_v63, %v568_v62  ;;  %v1747_v14 = vmov 0.0  }
  0xc5   : > { %1305 = vmatprep.subr.mxu0 %v2061_v17  ;;  %1350 = vmatprep.subr.mxu1 %v2061_v17 }
  0xc6   : > { %437 = vadd.xlane.f32.xlu0 %v417_v4  ;;  %v2223_v4 = vadd.s32 %v595_v0, %v594_v61 }
  0xc7   : > { %439 = vadd.xlane.f32.xlu1 %v418_v6 }
  0xc8   : > { %1306 = vmatpush3.xpose.msra.mxu0 %v2061_v17  ;;  %1366 = vmatpush3.xpose.msra.mxu1 %v2061_v17  ;;  %v408_v17 = vld [vmem:[%s1994_s28 + $0x58] sm:$0xff]  ;;  %vm606_vm3 = vcmp.eq.s32.totalorder %v585_v5, %v2223_v4 }
  0xc9   : > { %1307 = vmatprep.subr.mxu0 %v2052_v13  ;;  %1351 = vmatprep.subr.mxu1 %v2052_v13  ;;  %v424_v26 = vmul.f32 %v408_v17, %v376_v23  ;;  %v622_v16 = vsel %vm606_vm3, -1e+30, %v1747_v14 }
  0xca   : > { %441 = vadd.xlane.f32.xlu0 %v419_v12 }
  0xcb   : > { %443 = vadd.xlane.f32.xlu1 %v420_v15 }
  0xcc   : > { %1308 = vmatpush3.xpose.msra.mxu0 %v2052_v13  ;;  %1367 = vmatpush3.xpose.msra.mxu1 %v2052_v13  ;;  %v410_v13 = vld [vmem:[%s1994_s28 + $0x68] sm:$0xff] }
  0xcd   : > { %1309 = vmatprep.subr.mxu0 %v2045_v9  ;;  %1352 = vmatprep.subr.mxu1 %v2045_v9  ;;  %v426_v31 = vmul.f32 %v410_v13, %v378_v28 }
  0xce   : > { %445 = vadd.xlane.f32.xlu0 %v421_v19 }
  0xcf   : > { %447 = vadd.xlane.f32.xlu1 %v422_v21 }
  0xd0   : > { %1310 = vmatpush3.xpose.msra.mxu0 %v2045_v9  ;;  %1368 = vmatpush3.xpose.msra.mxu1 %v2045_v9  ;;  %v379_v9 = vld [vmem:[%s1980_s24 + $0x70] sm:$0xff] }
  0xd1   : > { %1311 = vmatprep.subr.mxu0 %v2039_v7  ;;  %1353 = vmatprep.subr.mxu1 %v2039_v7  ;;  %v427_v32 = vmul.f32 %v411_v30, %v379_v9 }
  0xd2   : > { %449 = vadd.xlane.f32.xlu0 %v423_v24 }
  0xd3   : > { %451 = vadd.xlane.f32.xlu1 %v424_v26 }
  0xd4   : > { %1312 = vmatpush3.xpose.msra.mxu0 %v2039_v7  ;;  %1369 = vmatpush3.xpose.msra.mxu1 %v2039_v7  ;;  %v380_v7 = vld [vmem:[%s1980_s24 + $0x78] sm:$0xff] }
  0xd5   : > { %1313 = vmatprep.subr.mxu0 %v2029_v3  ;;  %1354 = vmatprep.subr.mxu1 %v2029_v3 }
  0xd6   : > { %453 = vadd.xlane.f32.xlu0 %v425_v29 }
  0xd7   : > { %455 = vadd.xlane.f32.xlu1 %v426_v31 }
  0xd8   : > { %1314 = vmatpush3.xpose.msra.mxu0 %v2029_v3  ;;  %1370 = vmatpush3.xpose.msra.mxu1 %v2029_v3  ;;  %v428_v3 = vmul.f32 %v412_v33, %v380_v7  ;;  %v905_v33 = vsub.s32 0, %v2208_v57 }
  0xda   : > { %457 = vadd.xlane.f32.xlu0 %v427_v32 }
  0xdb   : > { %1316 = vmatmul.mubr.f32.vlgmr.msra.gmra.mxu0 %v2112_v54  ;;  %1328 = vmatmul.mubr.f32.vlgmr.msra.gmra.mxu1 %v374_v18  ;;  %v587_v18 = vadd.s32 %v2218_v63, %v570_v8 }
  0xdc   : > { %1318 = vmatprep.mubr.f32.mxu0 %v2122_v59  ;;  %1330 = vmatprep.mubr.f32.mxu1 %v375_v22 }
  0xdd   : > { %459 = vadd.xlane.f32.xlu1 %v428_v3  ;;  %vm608_vm5 = vcmp.eq.s32.totalorder %v587_v18, %v2223_v4 }
  0xdf   : > { %1319 = vmatmul.mubr.f32.gmra.mxu0 %v2125_v60  ;;  %1331 = vmatmul.mubr.f32.gmra.mxu1 %v376_v23  ;;  %v560_v60 = vadd.s32 8, %v2208_v57 }
  0xe0   : > { %1321 = vmatprep.mubr.f32.mxu0 %v2136_v1  ;;  %1333 = vmatprep.mubr.f32.mxu1 %v377_v27  ;;  %v579_v27 = vadd.s32 %v2218_v63, %v562_v20 }
  0xe2   : > { %vm600_vm7 = vcmp.eq.s32.totalorder %v579_v27, %v2223_v4 }
  0xe3   : > { %1322 = vmatmul.mubr.f32.gmra.mxu0 %v2139_v2  ;;  %1334 = vmatmul.mubr.f32.gmra.mxu1 %v378_v28  ;;  %v577_v2 = vadd.s32 %v2218_v63, %v560_v60  ;;  %v572_v60 = vadd.s32 104, %v2208_v57 }
  0xe4   : > { %1324 = vmatprep.mubr.f32.mxu0 %v2150_v10  ;;  %1336 = vmatprep.mubr.f32.mxu1 %v379_v9  ;;  %v567_v10 = vadd.s32 64, %v2208_v57  ;;  %v624_v9 = vsel %vm608_vm5, -1e+30, %v1747_v14 }
  0xe5   : > { %vm598_vm2 = vcmp.eq.s32.totalorder %v577_v2, %v2223_v4 }
  0xe6   : > { %v614_v15 = vsel %vm598_vm2, -1e+30, %v1747_v14  ;;  %v584_v19 = vadd.s32 %v2218_v63, %v567_v10  ;;  %v589_v10 = vadd.s32 %v2218_v63, %v572_v60  ;;  %vm886_vm2 = vcmask 7168  }
  0xe7   : > { %1325 = vmatmul.mubr.f32.gmra.mxu0 %v2153_v11  ;;  %1337 = vmatmul.mubr.f32.gmra.mxu1 %v380_v7  ;;  %v576_v11 = vadd.s32 %v2218_v63, %v2208_v57 }
  0xe8   : > { %vm605_vm6 = vcmp.eq.s32.totalorder %v584_v19, %v2223_v4  ;;  %vm610_vm11 = vcmp.eq.s32.totalorder %v589_v10, %v2223_v4 }
  0xe9   : > { %vm597_vm4 = vcmp.eq.s32.totalorder %v576_v11, %v2223_v4  ;;  %v621_v7 = vsel %vm605_vm6, -1e+30, %v1747_v14 }
  0xea   : > { %v613_v25 = vsel %vm597_vm4, -1e+30, %v1747_v14 }
 0x127   : > { %v494_v34 = vpop.xlane.xlu0 %493 }
 0x128   : > { %525 = vxpose.xlu0.b32.start [1/16] (narrow) %v494_v34, 8  ;;  %v498_v36 = vpop.xlane.xlu1 %497 }
 0x12b   : > { %v496_v35 = vpop.xlane.xlu0 %495 }
 0x12c   : > { %526 = vxpose.xlu0.b32.cont [2/16] (narrow) %v496_v35, 8  ;;  %v500_v37 = vpop.xlane.xlu1 %499  ;;  %v561_v35 = vadd.s32 16, %v2208_v57 }
 0x12f   : > { %v502_v38 = vpop.xlane.xlu0 %501 }
 0x130   : > { %527 = vxpose.xlu0.b32.cont [3/16] (narrow) %v498_v36, 8  ;;  %v504_v39 = vpop.xlane.xlu1 %503 }
 0x133   : > { %v506_v40 = vpop.xlane.xlu0 %505 }
 0x134   : > { %528 = vxpose.xlu0.b32.cont [4/16] (narrow) %v500_v37, 8  ;;  %v508_v41 = vpop.xlane.xlu1 %507 }
 0x137   : > { %v510_v42 = vpop.xlane.xlu0 %509 }
 0x138   : > { %529 = vxpose.xlu0.b32.cont [5/16] (narrow) %v502_v38, 8  ;;  %v512_v43 = vpop.xlane.xlu1 %511 }
 0x13b   : > { %v514_v44 = vpop.xlane.xlu0 %513 }
 0x13c   : > { %530 = vxpose.xlu0.b32.cont [6/16] (narrow) %v504_v39, 8  ;;  %v516_v45 = vpop.xlane.xlu1 %515 }
 0x13f   : > { %v518_v46 = vpop.xlane.xlu0 %517 }
 0x140   : > { %531 = vxpose.xlu0.b32.cont [7/16] (narrow) %v506_v40, 8  ;;  %v520_v47 = vpop.xlane.xlu1 %519  ;;  %v616_v40 = vsel %vm600_vm7, -1e+30, %v1747_v14 }
 0x143   : > { %v522_v48 = vpop.xlane.xlu0 %521 }
 0x144   : > { %532 = vxpose.xlu0.b32.cont [8/16] (narrow) %v508_v41, 8  ;;  %v524_v49 = vpop.xlane.xlu1 %523 }
 0x147   : > { %v2198_v50 = vpop.xlane.xlu0 %429 }
 0x148   : > { %533 = vxpose.xlu0.b32.cont [9/16] (narrow) %v510_v42, 8  ;;  %v432_v53 = vpop.xlane.xlu1 %431 }
 0x14b   : > { %v2200_v51 = vpop.xlane.xlu0 %433 }
 0x14c   : > { %534 = vxpose.xlu0.b32.cont [10/16] (narrow) %v512_v43, 8  ;;  %v2206_v56 = vpop.xlane.xlu1 %435  ;;  %v569_v43 = vadd.s32 80, %v2208_v57 }
 0x14f   : > { %v2202_v52 = vpop.xlane.xlu0 %437 }
 0x150   : > { %535 = vxpose.xlu0.b32.cont [11/16] (narrow) %v514_v44, 8  ;;  %v2214_v59 = vpop.xlane.xlu1 %439  ;;  %v578_v44 = vadd.s32 %v2218_v63, %v561_v35 }
 0x152   : > { %vm599_vm8 = vcmp.eq.s32.totalorder %v578_v44, %v2223_v4 }
 0x153   : > { %v2204_v54 = vpop.xlane.xlu0 %441  ;;  %v615_v0 = vsel %vm599_vm8, -1e+30, %v1747_v14 }
 0x154   : > { %536 = vxpose.xlu0.b32.cont [12/16] (narrow) %v516_v45, 8  ;;  %v2226_v6 = vpop.xlane.xlu1 %443 }
 0x157   : > { %v2210_v58 = vpop.xlane.xlu0 %445 }
 0x158   : > { %537 = vxpose.xlu0.b32.cont [13/16] (narrow) %v518_v46, 8  ;;  %v448_v21 = vpop.xlane.xlu1 %447 }
 0x15b   : > { %v2220_v1 = vpop.xlane.xlu0 %449 }
 0x15c   : > { %538 = vxpose.xlu0.b32.cont [14/16] (narrow) %v520_v47, 8  ;;  %v452_v55 = vpop.xlane.xlu1 %451 }
 0x15f   : > { %v2234_v12 = vpop.xlane.xlu0 %453 }
 0x160   : > { %539 = vxpose.xlu0.b32.cont [15/16] (narrow) %v522_v48, 8 }
 0x163   : > { %v2250_v28 = vpop.xlane.xlu0 %457 }
 0x164   : > { %540 = vxpose.xlu0.b32.end [16/16] (narrow) %v524_v49, 8 }
 0x19b   : > { %v1317_v17 = vpop.f32.mrf.mxu0  ;;  %v1329_v22 = vpop.f32.mrf.mxu1 }
 0x19c   : > { %v2242_v23 = vadd.f32 %v1317_v17, %v614_v15  ;;  %v2244_v24 = vadd.f32 %v1329_v22, %v622_v16  ;;  %v626_v17 = vsel %vm610_vm11, -1e+30, %v1747_v14 }
 0x19d   : > { %v695_v26 = vpop.f32.mrf.mxu0  ;;  %v735_v13 = vpop.f32.mrf.mxu1 }
 0x19e   : > { %v799_v29 = vsub.f32 %v2244_v24, %v448_v21  ;;  %v791_v30 = vsub.f32 %v2242_v23, %v432_v53  ;;  %v2254_v31 = vadd.f32 %v695_v26, %v613_v25  ;;  %v2261_v37 = vadd.f32 %v735_v13, %v621_v7 }
 0x19f   : > { %v1332_v3 = vpop.f32.mrf.mxu1  ;;  %v1320_v41 = vpop.f32.mrf.mxu0  ;;  %v564_v53 = vadd.s32 40, %v2208_v57 }
 0x1a0   : > { %v807_v32 = vmax.f32 %v791_v30, 0.0  ;;  %v815_v34 = vmax.f32 %v799_v29, 0.0  ;;  %v751_v36 = vadd.f32 %v1332_v3, %v624_v9  ;;  %v790_v39 = vsub.f32 %v2254_v31, %v2198_v50  ;;  %v456_v29 = vpop.xlane.xlu1 %455 }
 0x1a1   : > { %v711_v46 = vadd.f32 %v1320_v41, %v616_v40  ;;  %v798_v48 = vsub.f32 %v2261_v37, %v2210_v58  ;;  %v586_v50 = vadd.s32 %v2218_v63, %v569_v43  ;;  %v705_v2 = vpop.f32.mrf.mxu0  ;;  %v581_v58 = vadd.s32 %v2218_v63, %v564_v53  ;;  %v745_v16 = vpop.f32.mrf.mxu1 }
 0x1a2   : > { %840 = vadd.xlane.f32.xlu1 %v807_v32  ;;  %v806_v47 = vmax.f32 %v790_v39, 0.0  ;;  %v801_v5 = vsub.f32 %v751_v36, %v452_v55  ;;  %v706_v8 = vadd.f32 %v705_v2, %v615_v0  ;;  %v563_v40 = vadd.s32 32, %v2208_v57 }
 0x1a3   : > { %v814_v61 = vmax.f32 %v798_v48, 0.0  ;;  %v793_v62 = vsub.f32 %v711_v46, %v2206_v56  ;;  %vm607_vm9 = vcmp.eq.s32.totalorder %v586_v50, %v2223_v4  ;;  %vm602_vm10 = vcmp.eq.s32.totalorder %v581_v58, %v2223_v4  ;;  %v1323_v21 = vpop.f32.mrf.mxu0  ;;  %v1335_v13 = vpop.f32.mrf.mxu1 }
 0x1a4   : > { %v541_v38 = vpop.trf.xlu0  ;;  %v623_v15 = vsel %vm607_vm9, -1e+30, %v1747_v14  ;;  %v817_v18 = vmax.f32 %v801_v5, 0.0  ;;  %v792_v19 = vsub.f32 %v706_v8, %v2200_v51  ;;  %v618_v20 = vsel %vm602_vm10, -1e+30, %v1747_v14 }
 0x1a5   : > { %v2266_v42 = vrot.slane %v541_v38, %v905_v33  ;;  %v809_v11 = vmax.f32 %v793_v62, 0.0  ;;  %v746_v56 = vadd.f32 %v745_v16, %v623_v15  ;;  %v721_v22 = vadd.f32 %v1323_v21, %v618_v20  ;;  %v755_v60 = vpop.f32.mrf.mxu1 }
 0x1a6   : > { %856 = vadd.xlane.f32.xlu1 %v815_v34  ;;  %v808_v25 = vmax.f32 %v792_v19, 0.0  ;;  %v761_v27 = vadd.f32 %v1335_v13, %v626_v17  ;;  %v571_v43 = vadd.s32 96, %v2208_v57  ;;  %v574_v5 = vadd.s32 120, %v2208_v57 }
 0x1a7   : > { %v918_v45 = vsub.f32 %v751_v36, %v2266_v42  ;;  %v800_v26 = vsub.f32 %v746_v56, %v2220_v1  ;;  %v795_v9 = vsub.f32 %v721_v22, %v2214_v59  ;;  %v907_v33 = vsub.f32 %v2254_v31, %v2266_v42 }
 0x1a8   : > { %v803_v32 = vsub.f32 %v761_v27, %v456_v29  ;;  %v908_v1 = vsub.f32 %v2242_v23, %v2266_v42  ;;  %v909_v35 = vsub.f32 %v706_v8, %v2266_v42  ;;  %v910_v59 = vsub.f32 %v711_v46, %v2266_v42 }
 0x1a9   : > { %v934_v49 = vmax.f32 %v918_v45, 0.0  ;;  %v816_v30 = vmax.f32 %v800_v26, 0.0  ;;  %v811_v51 = vmax.f32 %v795_v9, 0.0  ;;  %v923_v3 = vmax.f32 %v907_v33, 0.0  ;;  %v460_v26 = vpop.xlane.xlu1 %459 }
 0x1aa   : > { %838 = vadd.xlane.f32.xlu1 %v806_v47  ;;  %v819_v7 = vmax.f32 %v803_v32, 0.0  ;;  %v924_v34 = vmax.f32 %v908_v1, 0.0  ;;  %v925_v36 = vmax.f32 %v909_v35, 0.0  ;;  %v926_v38 = vmax.f32 %v910_v59, 0.0 }
 0x1ab   : > { %977 = vadd.xlane.f32.xlu0 %v934_v49  ;;  %v912_v39 = vsub.f32 %v721_v22, %v2266_v42  ;;  %v915_v41 = vsub.f32 %v2261_v37, %v2266_v42  ;;  %v580_v23 = vadd.s32 %v2218_v63, %v563_v40  ;;  %v916_v45 = vsub.f32 %v2244_v24, %v2266_v42  ;;  %v715_v37 = vpop.f32.mrf.mxu0 }
 0x1ac   : > { %v588_v46 = vadd.s32 %v2218_v63, %v571_v43  ;;  %v917_v48 = vsub.f32 %v746_v56, %v2266_v42  ;;  %v920_v55 = vsub.f32 %v761_v27, %v2266_v42  ;;  %v573_v22 = vadd.s32 112, %v2208_v57 }
 0x1ad   : > { %v928_v31 = vmax.f32 %v912_v39, 0.0  ;;  %v931_v44 = vmax.f32 %v915_v41, 0.0  ;;  %vm601_vm12 = vcmp.eq.s32.totalorder %v580_v23, %v2223_v4  ;;  %v932_v47 = vmax.f32 %v916_v45, 0.0  ;;  %v1326_v56 = vpop.f32.mrf.mxu0 }
 0x1ae   : > { %854 = vadd.xlane.f32.xlu1 %v814_v61  ;;  %v617_v49 = vsel %vm601_vm12, -1e+30, %v1747_v14  ;;  %vm609_vm13 = vcmp.eq.s32.totalorder %v588_v46, %v2223_v4  ;;  %v933_v53 = vmax.f32 %v917_v48, 0.0  ;;  %v566_v61 = vadd.s32 56, %v2208_v57  ;;  %v822_v46 = vld [vmem:[#allocation2] sm:$0xff] }
 0x1af   : > { %v716_v50 = vadd.f32 %v715_v37, %v617_v49  ;;  %v625_v24 = vsel %vm609_vm13, -1e+30, %v1747_v14  ;;  %v936_v0 = vmax.f32 %v920_v55, 0.0  ;;  %v830_v49 = vld [vmem:[#allocation2 + $0x40] sm:$0xff] }
 0x1b0   : > { %v756_v62 = vadd.f32 %v755_v60, %v625_v24  ;;  %v583_v58 = vadd.s32 %v2218_v63, %v566_v61  ;;  %v833_v24 = vld [vmem:[#allocation2 + $0x58] sm:$0xff] }
 0x1b1   : > { %v794_v2 = vsub.f32 %v716_v50, %v2202_v52  ;;  %v911_v16 = vsub.f32 %v716_v50, %v2266_v42  ;;  %v565_v52 = vadd.s32 48, %v2208_v57  ;;  %v825_v50 = vld [vmem:[#allocation2 + $0x18] sm:$0xff] }
 0x1b2   : > { %844 = vadd.xlane.f32.xlu1 %v809_v11  ;;  %v802_v10 = vsub.f32 %v756_v62, %v2234_v12  ;;  %vm604_vm14 = vcmp.eq.s32.totalorder %v583_v58, %v2223_v4  ;;  %v591_v11 = vadd.s32 %v2218_v63, %v574_v5  ;;  %v919_v12 = vsub.f32 %v756_v62, %v2266_v42  ;;  %v824_v62 = vld [vmem:[#allocation2 + $0x10] sm:$0xff] }
 0x1b3   : > { %v810_v8 = vmax.f32 %v794_v2, 0.0  ;;  %v927_v20 = vmax.f32 %v911_v16, 0.0  ;;  %v582_v17 = vadd.s32 %v2218_v63, %v565_v52  ;;  %v832_v58 = vld [vmem:[#allocation2 + $0x50] sm:$0xff]  ;;  %v835_v52 = vld [vmem:[#allocation2 + $0x68] sm:$0xff] }
 0x1b4   : > { %v818_v15 = vmax.f32 %v802_v10, 0.0  ;;  %vm612_vm15 = vcmp.eq.s32.totalorder %v591_v11, %v2223_v4  ;;  %v935_v27 = vmax.f32 %v919_v12, 0.0 }
 0x1b5   : > { %v628_v21 = vsel %vm612_vm15, -1e+30, %v1747_v14  ;;  %vm603_vm0 = vcmp.eq.s32.totalorder %v582_v17, %v2223_v4 }
 0x1b6   : > { %860 = vadd.xlane.f32.xlu1 %v817_v18  ;;  %v620_v18 = vsel %vm604_vm14, -1e+30, %v1747_v14 }
 0x1b7   : > { %v731_v19 = vadd.f32 %v1326_v56, %v620_v18 }
 0x1b9   : > { %v797_v29 = vsub.f32 %v731_v19, %v2226_v6 }
 0x1ba   : > { %842 = vadd.xlane.f32.xlu1 %v808_v25  ;;  %v1338_v25 = vpop.f32.mrf.mxu1 }
 0x1bb   : > { %v771_v13 = vadd.f32 %v1338_v25, %v628_v21  ;;  %v813_v32 = vmax.f32 %v797_v29, 0.0 }
 0x1bc   : > { %v765_v6 = vpop.f32.mrf.mxu1 }
 0x1bd   : > { %v805_v9 = vsub.f32 %v771_v13, %v460_v26 }
 0x1be   : > { %858 = vadd.xlane.f32.xlu1 %v816_v30  ;;  %v590_v30 = vadd.s32 %v2218_v63, %v573_v22 }
 0x1bf   : > { %v821_v57 = vmax.f32 %v805_v9, 0.0 }
 0x1c0   : > { %vm611_vm1 = vcmp.eq.s32.totalorder %v590_v30, %v2223_v4 }
 0x1c1   : > { %v627_v1 = vsel %vm611_vm1, -1e+30, %v1747_v14 }
 0x1c2   : > { %848 = vadd.xlane.f32.xlu1 %v811_v51  ;;  %v619_v51 = vsel %vm603_vm0, -1e+30, %v1747_v14 }
 0x1c6   : > { %864 = vadd.xlane.f32.xlu1 %v819_v7  ;;  %v725_v7 = vpop.f32.mrf.mxu0 }
 0x1c7   : > { %v726_v33 = vadd.f32 %v725_v7, %v619_v51 }
 0x1c9   : > { %v796_v63 = vsub.f32 %v726_v33, %v2204_v54  ;;  %v913_v4 = vsub.f32 %v726_v33, %v2266_v42  ;;  %v823_v54 = vld [vmem:[#allocation2 + $0x8] sm:$0xff] }
 0x1ca   : > { %955 = vadd.xlane.f32.xlu1 %v923_v3  ;;  %v914_v3 = vsub.f32 %v731_v19, %v2266_v42 }
 0x1cb   : > { %v929_v39 = vmax.f32 %v913_v4, 0.0 }
 0x1cc   : > { %v930_v35 = vmax.f32 %v914_v3, 0.0 }
 0x1ce   : > { %957 = vadd.xlane.f32.xlu1 %v924_v34  ;;  %v766_v34 = vadd.f32 %v765_v6, %v627_v1 }
 0x1d0   : > { %v804_v59 = vsub.f32 %v766_v34, %v2250_v28  ;;  %v921_v40 = vsub.f32 %v766_v34, %v2266_v42  ;;  %v831_v28 = vld [vmem:[#allocation2 + $0x48] sm:$0xff] }
 0x1d2   : > { %959 = vadd.xlane.f32.xlu1 %v925_v36  ;;  %v812_v36 = vmax.f32 %v796_v63, 0.0  ;;  %v937_v14 = vmax.f32 %v921_v40, 0.0  ;;  %v826_v40 = vld [vmem:[#allocation2 + $0x20] sm:$0xff] }
 0x1d6   : > { %961 = vadd.xlane.f32.xlu1 %v926_v38  ;;  %v820_v38 = vmax.f32 %v804_v59, 0.0 }
 0x1da   : > { %965 = vadd.xlane.f32.xlu1 %v928_v31  ;;  %v922_v31 = vsub.f32 %v771_v13, %v2266_v42 }
 0x1dc   : > { %v938_v41 = vmax.f32 %v922_v31, 0.0 }
 0x1de   : > { %971 = vadd.xlane.f32.xlu1 %v931_v44 }
 0x1e2   : > { %973 = vadd.xlane.f32.xlu1 %v932_v47 }
 0x1e6   : > { %975 = vadd.xlane.f32.xlu1 %v933_v53 }
 0x1ea   : > { %981 = vadd.xlane.f32.xlu1 %v936_v0 }
 0x1ee   : > { %846 = vadd.xlane.f32.xlu1 %v810_v8 }
 0x1f2   : > { %862 = vadd.xlane.f32.xlu1 %v818_v15  ;;  %v827_v15 = vld [vmem:[#allocation2 + $0x28] sm:$0xff] }
 0x1f6   : > { %963 = vadd.xlane.f32.xlu1 %v927_v20 }
 0x1fa   : > { %979 = vadd.xlane.f32.xlu1 %v935_v27 }
 0x1fe   : > { %852 = vadd.xlane.f32.xlu1 %v813_v32 }
 0x202   : > { %868 = vadd.xlane.f32.xlu1 %v821_v57 }
 0x206   : > { %969 = vadd.xlane.f32.xlu1 %v930_v35 }
 0x20a   : > { %850 = vadd.xlane.f32.xlu1 %v812_v36 }
 0x20e   : > { %866 = vadd.xlane.f32.xlu1 %v820_v38 }
 0x212   : > { %967 = vadd.xlane.f32.xlu1 %v929_v39 }
 0x216   : > { %983 = vadd.xlane.f32.xlu1 %v937_v14 }
 0x21a   : > { %985 = vadd.xlane.f32.xlu1 %v938_v41  ;;  %v834_v41 = vld [vmem:[#allocation2 + $0x60] sm:$0xff] }
 0x22b   : > { %v841_v23 = vpop.xlane.xlu1 %840 }
 0x22c   : > { %v871_v43 = vadd.f32 %v841_v23, %v823_v54 }
 0x22e   : > { %888 = vst.msk [vmem:[#allocation2 + $0x8] sm:$0xff] %vm886_vm2, %v871_v43 }
 0x22f   : > { %v857_v44 = vpop.xlane.xlu1 %856 }
 0x230   : > { %v879_v45 = vadd.f32 %v857_v44, %v831_v28 }
 0x232   : > { %896 = vst.msk [vmem:[#allocation2 + $0x48] sm:$0xff] %vm886_vm2, %v879_v45 }
 0x233   : > { %v839_v47 = vpop.xlane.xlu1 %838 }
 0x234   : > { %v870_v48 = vadd.f32 %v839_v47, %v822_v46  ;;  %v978_v11 = vpop.xlane.xlu0 %977  ;;  %v829_v47 = vld [vmem:[#allocation2 + $0x38] sm:$0xff] }
 0x235   : > { %v940_v22 = vld [vmem:[#allocation2 + $0x8] sm:$0xff] }
 0x236   : > { %887 = vst.msk [vmem:[#allocation2] sm:$0xff] %vm886_vm2, %v870_v48 }
 0x237   : > { %v855_v42 = vpop.xlane.xlu1 %854 }
 0x238   : > { %v878_v37 = vadd.f32 %v855_v42, %v830_v49 }
 0x239   : > { %v948_v6 = vld [vmem:[#allocation2 + $0x48] sm:$0xff] }
 0x23a   : > { %895 = vst.msk [vmem:[#allocation2 + $0x40] sm:$0xff] %vm886_vm2, %v878_v37  ;;  %v837_v37 = vld [vmem:[#allocation2 + $0x78] sm:$0xff] }
 0x23b   : > { %v845_v53 = vpop.xlane.xlu1 %844 }
 0x23c   : > { %v873_v55 = vadd.f32 %v845_v53, %v825_v50 }
 0x23d   : > { %v939_v12 = vld [vmem:[#allocation2] sm:$0xff] }
 0x23e   : > { %890 = vst.msk [vmem:[#allocation2 + $0x18] sm:$0xff] %vm886_vm2, %v873_v55 }
 0x23f   : > { %v861_v60 = vpop.xlane.xlu1 %860 }
 0x240   : > { %v881_v61 = vadd.f32 %v861_v60, %v833_v24  ;;  %v828_v60 = vld [vmem:[#allocation2 + $0x30] sm:$0xff] }
 0x241   : > { %v947_v33 = vld [vmem:[#allocation2 + $0x40] sm:$0xff] }
 0x242   : > { %898 = vst.msk [vmem:[#allocation2 + $0x58] sm:$0xff] %vm886_vm2, %v881_v61 }
 0x243   : > { %v843_v0 = vpop.xlane.xlu1 %842 }
 0x244   : > { %v872_v2 = vadd.f32 %v843_v0, %v824_v62 }
 0x245   : > { %v942_v30 = vld [vmem:[#allocation2 + $0x18] sm:$0xff] }
 0x246   : > { %889 = vst.msk [vmem:[#allocation2 + $0x10] sm:$0xff] %vm886_vm2, %v872_v2  ;;  %v836_v2 = vld [vmem:[#allocation2 + $0x70] sm:$0xff] }
 0x247   : > { %v859_v5 = vpop.xlane.xlu1 %858 }
 0x248   : > { %v880_v8 = vadd.f32 %v859_v5, %v832_v58 }
 0x249   : > { %v950_v10 = vld [vmem:[#allocation2 + $0x58] sm:$0xff] }
 0x24a   : > { %v998_v16 = vadd.f32 %v978_v11, %v950_v10  ;;  %897 = vst.msk [vmem:[#allocation2 + $0x50] sm:$0xff] %vm886_vm2, %v880_v8 }
 0x24b   : > { %v849_v18 = vpop.xlane.xlu1 %848 }
 0x24c   : > { %1014 = vst.msk [vmem:[#allocation2 + $0x58] sm:$0xff] %vm886_vm2, %v998_v16  ;;  %v875_v56 = vadd.f32 %v849_v18, %v827_v15 }
 0x24d   : > { %v941_v13 = vld [vmem:[#allocation2 + $0x10] sm:$0xff] }
 0x24e   : > { %892 = vst.msk [vmem:[#allocation2 + $0x28] sm:$0xff] %vm886_vm2, %v875_v56 }
 0x24f   : > { %v865_v19 = vpop.xlane.xlu1 %864 }
 0x250   : > { %v883_v20 = vadd.f32 %v865_v19, %v835_v52 }
 0x251   : > { %v949_v63 = vld [vmem:[#allocation2 + $0x50] sm:$0xff] }
 0x252   : > { %900 = vst.msk [vmem:[#allocation2 + $0x68] sm:$0xff] %vm886_vm2, %v883_v20 }
 0x253   : > { %v956_v21 = vpop.xlane.xlu1 %955 }
 0x254   : > { %v987_v17 = vadd.f32 %v956_v21, %v939_v12 }
 0x255   : > { %v944_v51 = vld [vmem:[#allocation2 + $0x28] sm:$0xff] }
 0x256   : > { %1003 = vst.msk [vmem:[#allocation2] sm:$0xff] %vm886_vm2, %v987_v17 }
 0x257   : > { %v958_v25 = vpop.xlane.xlu1 %957 }
 0x258   : > { %v988_v26 = vadd.f32 %v958_v25, %v940_v22 }
 0x259   : > { %v952_v38 = vld [vmem:[#allocation2 + $0x68] sm:$0xff] }
 0x25a   : > { %1004 = vst.msk [vmem:[#allocation2 + $0x8] sm:$0xff] %vm886_vm2, %v988_v26 }
 0x25b   : > { %v960_v27 = vpop.xlane.xlu1 %959 }
 0x25c   : > { %v989_v29 = vadd.f32 %v960_v27, %v941_v13 }
 0x25e   : > { %1005 = vst.msk [vmem:[#allocation2 + $0x10] sm:$0xff] %vm886_vm2, %v989_v29 }
 0x25f   : > { %v962_v9 = vpop.xlane.xlu1 %961 }
 0x260   : > { %v990_v32 = vadd.f32 %v962_v9, %v942_v30 }
 0x262   : > { %1006 = vst.msk [vmem:[#allocation2 + $0x18] sm:$0xff] %vm886_vm2, %v990_v32 }
 0x263   : > { %v966_v7 = vpop.xlane.xlu1 %965 }
 0x264   : > { %v992_v57 = vadd.f32 %v966_v7, %v944_v51 }
 0x266   : > { %1008 = vst.msk [vmem:[#allocation2 + $0x28] sm:$0xff] %vm886_vm2, %v992_v57 }
 0x267   : > { %v972_v3 = vpop.xlane.xlu1 %971 }
 0x268   : > { %v995_v1 = vadd.f32 %v972_v3, %v947_v33 }
 0x26a   : > { %1011 = vst.msk [vmem:[#allocation2 + $0x40] sm:$0xff] %vm886_vm2, %v995_v1 }
 0x26b   : > { %v974_v34 = vpop.xlane.xlu1 %973 }
 0x26c   : > { %v996_v35 = vadd.f32 %v974_v34, %v948_v6 }
 0x26e   : > { %1012 = vst.msk [vmem:[#allocation2 + $0x48] sm:$0xff] %vm886_vm2, %v996_v35 }
 0x26f   : > { %v976_v36 = vpop.xlane.xlu1 %975 }
 0x270   : > { %v997_v59 = vadd.f32 %v976_v36, %v949_v63 }
 0x272   : > { %1013 = vst.msk [vmem:[#allocation2 + $0x50] sm:$0xff] %vm886_vm2, %v997_v59 }
 0x273   : > { %v982_v4 = vpop.xlane.xlu1 %981 }
 0x274   : > { %v1000_v39 = vadd.f32 %v982_v4, %v952_v38 }
 0x276   : > { %1016 = vst.msk [vmem:[#allocation2 + $0x68] sm:$0xff] %vm886_vm2, %v1000_v39 }
 0x277   : > { %v847_v14 = vpop.xlane.xlu1 %846 }
 0x278   : > { %v874_v31 = vadd.f32 %v847_v14, %v826_v40 }
 0x27a   : > { %891 = vst.msk [vmem:[#allocation2 + $0x20] sm:$0xff] %vm886_vm2, %v874_v31 }
 0x27b   : > { %v863_v54 = vpop.xlane.xlu1 %862 }
 0x27c   : > { %v882_v23 = vadd.f32 %v863_v54, %v834_v41 }
 0x27e   : > { %899 = vst.msk [vmem:[#allocation2 + $0x60] sm:$0xff] %vm886_vm2, %v882_v23 }
 0x27f   : > { %v964_v43 = vpop.xlane.xlu1 %963 }
 0x281   : > { %v943_v28 = vld [vmem:[#allocation2 + $0x20] sm:$0xff] }
 0x282   : > { %v991_v44 = vadd.f32 %v964_v43, %v943_v28 }
 0x283   : > { %v980_v45 = vpop.xlane.xlu1 %979 }
 0x284   : > { %1007 = vst.msk [vmem:[#allocation2 + $0x20] sm:$0xff] %vm886_vm2, %v991_v44 }
 0x285   : > { %v951_v46 = vld [vmem:[#allocation2 + $0x60] sm:$0xff] }
 0x286   : > { %v999_v48 = vadd.f32 %v980_v45, %v951_v46 }
 0x287   : > { %v853_v49 = vpop.xlane.xlu1 %852 }
 0x288   : > { %1015 = vst.msk [vmem:[#allocation2 + $0x60] sm:$0xff] %vm886_vm2, %v999_v48  ;;  %v877_v42 = vadd.f32 %v853_v49, %v829_v47 }
 0x28a   : > { %894 = vst.msk [vmem:[#allocation2 + $0x38] sm:$0xff] %vm886_vm2, %v877_v42 }
 0x28b   : > { %v869_v50 = vpop.xlane.xlu1 %868 }
 0x28c   : > { %v885_v53 = vadd.f32 %v869_v50, %v837_v37 }
 0x28e   : > { %902 = vst.msk [vmem:[#allocation2 + $0x78] sm:$0xff] %vm886_vm2, %v885_v53 }
 0x28f   : > { %v970_v55 = vpop.xlane.xlu1 %969 }
 0x291   : > { %v946_v24 = vld [vmem:[#allocation2 + $0x38] sm:$0xff] }
 0x292   : > { %v994_v61 = vadd.f32 %v970_v55, %v946_v24 }
 0x293   : > { %v851_v62 = vpop.xlane.xlu1 %850 }
 0x294   : > { %1010 = vst.msk [vmem:[#allocation2 + $0x38] sm:$0xff] %vm886_vm2, %v994_v61  ;;  %v876_v0 = vadd.f32 %v851_v62, %v828_v60 }
 0x295   : > { %v954_v56 = vld [vmem:[#allocation2 + $0x78] sm:$0xff] }
 0x296   : > { %893 = vst.msk [vmem:[#allocation2 + $0x30] sm:$0xff] %vm886_vm2, %v876_v0 }
 0x297   : > { %v867_v58 = vpop.xlane.xlu1 %866 }
 0x298   : > { %v884_v5 = vadd.f32 %v867_v58, %v836_v2 }
 0x29a   : > { %901 = vst.msk [vmem:[#allocation2 + $0x70] sm:$0xff] %vm886_vm2, %v884_v5 }
 0x29b   : > { %v968_v8 = vpop.xlane.xlu1 %967 }
 0x29d   : > { %v945_v10 = vld [vmem:[#allocation2 + $0x30] sm:$0xff] }
 0x29e   : > { %v993_v11 = vadd.f32 %v968_v8, %v945_v10 }
 0x29f   : > { %v984_v15 = vpop.xlane.xlu1 %983 }
 0x2a0   : > { %1009 = vst.msk [vmem:[#allocation2 + $0x30] sm:$0xff] %vm886_vm2, %v993_v11 }
 0x2a1   : > { %v953_v16 = vld [vmem:[#allocation2 + $0x70] sm:$0xff] }
 0x2a2   : > { %v1001_v18 = vadd.f32 %v984_v15, %v953_v16  ;;  %1022 = sbr.rel (%p1242_p7) target bundleno = 915 (0x393), region = 64 }
 0x2a3   : > { %v986_v52 = vpop.xlane.xlu1 %985 }
 0x2a4   : > { %1017 = vst.msk [vmem:[#allocation2 + $0x70] sm:$0xff] %vm886_vm2, %v1001_v18  ;;  %v1002_v19 = vadd.f32 %v986_v52, %v954_v56 }
 0x2a6   : > { %1018 = vst.msk [vmem:[#allocation2 + $0x78] sm:$0xff] %vm886_vm2, %v1002_v19 }
 0x2a7   : > { %v1024_v20 = vld [vmem:[#allocation2] sm:$0xff]  ;;  %v1025_v12 = vld [vmem:[#allocation2 + $0x8] sm:$0xff]  ;;  %v1026_v21 = vld [vmem:[#allocation2 + $0x10] sm:$0xff]  ;;  %vm1082_vm3 = vcmask 0  }
 0x2a8   : > { %v1027_v17 = vld [vmem:[#allocation2 + $0x18] sm:$0xff]  ;;  %v1040_v22 = vsel %vm886_vm2, %v1024_v20, 0.0  ;;  %v1041_v25 = vsel %vm886_vm2, %v1025_v12, 0.0  ;;  %v1043_v26 = vsel %vm886_vm2, %v1026_v21, 0.0  ;;  %v1028_v13 = vld [vmem:[#allocation2 + $0x20] sm:$0xff]  ;;  %v1029_v30 = vld [vmem:[#allocation2 + $0x28] sm:$0xff] }
 0x2a9   : > { %v1042_v27 = vadd.f32 %v1041_v25, %v1040_v22  ;;  %v1045_v29 = vsel %vm886_vm2, %v1027_v17, 0.0  ;;  %v1047_v32 = vsel %vm886_vm2, %v1028_v13, 0.0  ;;  %v1030_v51 = vld [vmem:[#allocation2 + $0x30] sm:$0xff]  ;;  %v1049_v57 = vsel %vm886_vm2, %v1029_v30, 0.0  ;;  %v1031_v33 = vld [vmem:[#allocation2 + $0x38] sm:$0xff]  ;;  %v1032_v6 = vld [vmem:[#allocation2 + $0x40] sm:$0xff] }
 0x2aa   : > { %v1051_v1 = vsel %vm886_vm2, %v1030_v51, 0.0  ;;  %v1053_v35 = vsel %vm886_vm2, %v1031_v33, 0.0  ;;  %v1033_v63 = vld [vmem:[#allocation2 + $0x48] sm:$0xff]  ;;  %v1055_v59 = vsel %vm886_vm2, %v1032_v6, 0.0  ;;  %v1034_v38 = vld [vmem:[#allocation2 + $0x50] sm:$0xff]  ;;  %v1035_v40 = vld [vmem:[#allocation2 + $0x58] sm:$0xff] }
 0x2ab   : > { %v1044_v9 = vadd.f32 %v1043_v26, %v1042_v27  ;;  %v1057_v39 = vsel %vm886_vm2, %v1033_v63, 0.0  ;;  %v1059_v31 = vsel %vm886_vm2, %v1034_v38, 0.0  ;;  %v1036_v41 = vld [vmem:[#allocation2 + $0x60] sm:$0xff]  ;;  %v1061_v23 = vsel %vm886_vm2, %v1035_v40, 0.0  ;;  %v1037_v43 = vld [vmem:[#allocation2 + $0x68] sm:$0xff]  ;;  %v1038_v45 = vld [vmem:[#allocation2 + $0x70] sm:$0xff] }
 0x2ac   : > { %v1063_v44 = vsel %vm886_vm2, %v1036_v41, 0.0  ;;  %v1065_v47 = vsel %vm886_vm2, %v1037_v43, 0.0  ;;  %v1067_v42 = vsel %vm886_vm2, %v1038_v45, 0.0  ;;  %v1023_v5 = vld [vmem:[#allocation12] sm:$0x1] }
 0x2ad   : > { %v1046_v7 = vadd.f32 %v1045_v29, %v1044_v9  ;;  %v1039_v48 = vld [vmem:[#allocation2 + $0x78] sm:$0xff] }
 0x2ae   : > { %v1069_v50 = vsel %vm886_vm2, %v1039_v48, 0.0 }
 0x2af   : > { %v1048_v3 = vadd.f32 %v1047_v32, %v1046_v7 }
 0x2b1   : > { %v1050_v34 = vadd.f32 %v1049_v57, %v1048_v3 }
 0x2b3   : > { %v1052_v36 = vadd.f32 %v1051_v1, %v1050_v34 }
 0x2b5   : > { %v1054_v4 = vadd.f32 %v1053_v35, %v1052_v36 }
 0x2b7   : > { %v1056_v14 = vadd.f32 %v1055_v59, %v1054_v4 }
 0x2b9   : > { %v1058_v54 = vadd.f32 %v1057_v39, %v1056_v14 }
 0x2bb   : > { %v1060_v28 = vadd.f32 %v1059_v31, %v1058_v54 }
 0x2bd   : > { %v1062_v46 = vadd.f32 %v1061_v23, %v1060_v28 }
 0x2bf   : > { %v1064_v49 = vadd.f32 %v1063_v44, %v1062_v46 }
 0x2c1   : > { %v1066_v37 = vadd.f32 %v1065_v47, %v1064_v49 }
 0x2c3   : > { %v1068_v53 = vadd.f32 %v1067_v42, %v1066_v37 }
 0x2c5   : > { %v1070_v55 = vadd.f32 %v1069_v50, %v1068_v53 }
 0x2c7   : > { %1071 = vadd.xlane.f32.xlu0 %v1070_v55 }
 0x350   : > { %v1072_v24 = vpop.xlane.xlu0 %1071 }
 0x351   : > { %v1073_v60 = vrot.slane %v1072_v24, 4 }
 0x353   : > { %v1074_v61 = vadd.f32 %v1073_v60, %v1072_v24 }
 0x355   : > { %v1075_v62 = vrot.slane %v1074_v61, 2 }
 0x357   : > { %v1076_v0 = vadd.f32 %v1075_v62, %v1074_v61 }
 0x359   : > { %v1077_v2 = vrot.slane %v1076_v0, 1 }
 0x35b   : > { %v1078_v58 = vadd.f32 %v1077_v2, %v1076_v0 }
 0x35d   : > { %1371 = vpush %v1078_v58 }
 0x38e   : > { %s1372_s29 = spop %1371 }
 0x38f   : > { %v1080_v8 = vstv %s1372_s29 }
 0x390   : > { %v1081_v10 = vadd.f32 %v1080_v8, %v1023_v5 }
 0x392   : > { %1083 = vst.msk [vmem:[#allocation12] sm:$0x1] %vm1082_vm3, %v1081_v10 }
 0x393 PF: > { %p1399_p10 = scmp.eq.s32.totalorder %s1828_s26, 3  ;;  %s1748_s9 = smov [#allocation12]  }
 0x394   : > { %s1091_s10 = sshll.u32 %s1748_s9, 4  ;;  %s1092_s10 = int_to_ptr.vmem [resolvable:$true] %s1091_s10 }
 0x395   : > { %s1607_s1 = scalar_lea.vmem %s1092_s10, 16  ;;  %s1613_s24 = scalar_lea.vmem %s1092_s10, 32 }
 0x396   : > { %p1608_p12 = scmp.ne.s32.totalorder %s1092_s10, %s1607_s1  ;;  %p1614_p8 = scmp.lt.s32.totalorder %s1092_s10, %s1092_s10 }
 0x397   : > { %p1615_p1 = scmp.lt.s32.totalorder %s1613_s24, %s1607_s1 }
 0x398   : > { %p1609_p11 = pnand %p1608_p12, %p1399_p10 }
 0x399   : > { %p1616_p13 = por %p1615_p1, %p1614_p8 }
 0x39a   : > { %p1610_p0 = pneg %p1609_p11 }
 0x39c   : > { %p1617_p3 = pnand %p1616_p13, %p1610_p0 }
 0x39e   : > { %1620 = shalt.err (!%p1617_p3)
}
 0x39f   : > { %s2483_s22 = sld [smem:[#allocation27_spill]] }
 0x3a5   : > { %1382 = dma.vmem_to_hbm [thread:$0]  (%p1399_p10), %s1092_s10, 16, %s2483_s22, [#allocation6]  }
 0x3a6   : > { %1692 = dma.done.wait (%p1399_p10), [#allocation6], 16  }
 0x3a7   : > { %1694 = vsyncadd (%p1399_p10), [#allocation6], 4294967280 }
 0x3a8 PF: > { %s24_s25 = sadd.s32 1, %s1737_s25   ;;  %s2484_s5 = sld [smem:[#allocation23_spill]] }
 0x3a9   : > { %p21_p4 = scmp.ge.s32.totalorder %s24_s25, 6   ;;  %s2485_s22 = sld [smem:[#allocation20_spill]] }
 0x3aa   : > { %s2486_s8 = sld [smem:[#allocation21_spill]]  ;;  %s2488_s15 = smov %s1701_s16 }
 0x3ab   : > { %s2487_s24 = sld [smem:[#allocation24_spill]]  ;;  %s2489_s16 = smov %s1705_s17 }
 0x3ac   : > { %s2491_s18 = smov %s1713_s19  ;;  %s2492_s19 = smov %s1717_s20 }
 0x3ad   : > { %s2493_s20 = smov %s1928_s4  ;;  %s2494_s21 = smov %s1729_s23 }
 0x3ae   : > { %s2490_s17 = smov %s2484_s5  ;;  %23 = sbr.rel (!%p21_p4) target bundleno = 16 (0x10), region = 122 }
 0x3b0   : > { %s2495_s23 = smov %s2486_s8 }
 0x3b3   :  { %1104 = vsyncpa [#allocation5], 1 }
 0x3b4   :  { %1106 = vsyncpa [#allocation5 + $0x1], 1 }
 0x3b5   :  { %1107 = vsyncpa [#allocation8], 1 }
 0x3b6   :  { %1109 = vsyncpa [#allocation8 + $0x1], 1 }
 0x3b7   :  { %1110 = vsyncpa [#allocation11], 1 }
 0x3b8   :  { %1112 = vsyncpa [#allocation11 + $0x1], 1 }
 0x3b9   :  { %1113 = vsyncpa [#allocation6], 1 }
 0x3ba   :  { %1115 = vsyncpa [#allocation6 + $0x1], 1 }

</bundles_post_ra>
